<compile_context>
chip_gen: v6e
topology: v6e:2x2x1
jax: 0.10.0
libtpu: 0.0.40
codegen_flags: <defaults>
</compile_context>

<pallas_src>
import itertools

import jax
import jax.numpy as jnp
from jax.experimental import pallas as pl
from jax.experimental.pallas import tpu as pltpu


# ----------------------------- Pallas kernel -------------------------------

def _population_game_kernel(sender_order_ref, recv_block_order_ref,   # scalar prefetch
                            x_ref, ws_ref, bs_ref, wr_ref, br_ref,     # inputs
                            loss_ref, recon_ref,                       # outputs
                            msg_ref):                                  # VMEM scratch
    d = x_ref.shape[1]
    rd = wr_ref.shape[2]
    r_blk = rd // d                                  # static at trace time

    # --- Sender + channel: only once per sender (receiver-block 0). ---------
    @pl.when(pl.program_id(1) == 0)
    def _compute_message():
        x_bf16 = x_ref[...].astype(jnp.bfloat16)
        logits = jnp.dot(x_bf16, ws_ref[0],
                         preferred_element_type=jnp.float32) + bs_ref[0]   # (B, V) f32
        m = jnp.max(logits, axis=-1, keepdims=True)
        e = jnp.exp(logits - m)
        denom = jnp.sum(e, axis=-1, keepdims=True)
        msg_ref[...] = (e / denom).astype(jnp.bfloat16)   # exact softmax, cached bf16

    # --- Receiver block: (B, V) @ (V, R_BLK*D) fills the 256-wide MXU. ------
    recon = jnp.dot(msg_ref[...], wr_ref[0],
                    preferred_element_type=jnp.float32) + br_ref[0]        # (B, RD) f32
    recon_ref[0, 0] = recon.astype(jnp.bfloat16)          # lane-dense bf16 writeback

    # --- Loss: per-receiver SSE partials, reduced over batch (sublanes). ----
    x_f32 = x_ref[...]
    x_tiled = jnp.concatenate([x_f32] * r_blk, axis=-1)   # (B, RD) f32
    diff = recon - x_tiled
    loss_ref[0, 0] = jnp.sum(diff * diff, axis=0, keepdims=True)           # (1, RD)


# ----------------------------- host wrapper ---------------------------------

def population_game_sweep(x, w_send, b_send, w_recv, b_recv,
                          sender_order, recv_block_order, r_blk):
    """Runs every scheduled (sender, receiver) game in a SINGLE pallas_call.

    x            : (B, D) f32          — B, D multiples of 128 (pad if not)
    w_send       : (N_s, D, V) f32     b_send : (N_s, 1, V) f32
    w_recv       : (N_r, V, D) f32     b_recv : (N_r, 1, D) f32
    sender_order : (n_sender_steps,)   int32 — sender index per outer grid step
    recv_block_order : (n_recv_steps,) int32 — receiver-block index per inner step
    r_blk        : receivers packed per grid step (static int)
    returns      : losses (n_steps,) f32, recons (n_steps, B, D) bf16
                   ordered sender-major, receiver ascending within a block.
    """
    B, D = x.shape
    n_s, _, V = w_send.shape
    n_r = w_recv.shape[0]
    assert n_r % r_blk == 0
    n_rb = n_r // r_blk
    RD = r_blk * D
    n_outer = sender_order.shape[0]
    n_inner = recv_block_order.shape[0]

    # bf16 matmul operands (native MXU rate, half the weight-DMA bytes).
    # TODO(synk): in production pre-pack these once outside the jitted step.
    w_send_bf16 = w_send.astype(jnp.bfloat16)
    w_recv_packed = (w_recv.astype(jnp.bfloat16)
                     .reshape(n_rb, r_blk, V, D)
                     .transpose(0, 2, 1, 3)
                     .reshape(n_rb, V, RD))                 # (N_rb, V, R_BLK*D)
    b_recv_packed = b_recv.reshape(n_rb, 1, RD)             # f32

    grid_spec = pltpu.PrefetchScalarGridSpec(
        num_scalar_prefetch=2,       # sender_order / recv_block_order land in SMEM
        grid=(n_outer, n_inner),
        in_specs=[
            pl.BlockSpec((B, D),     lambda i, j, so, ro: (0, 0)),          # x (reused)
            pl.BlockSpec((1, D, V),  lambda i, j, so, ro: (so[i], 0, 0)),   # sender W
            pl.BlockSpec((1, 1, V),  lambda i, j, so, ro: (so[i], 0, 0)),   # sender b
            pl.BlockSpec((1, V, RD), lambda i, j, so, ro: (ro[j], 0, 0)),   # receiver W block
            pl.BlockSpec((1, 1, RD), lambda i, j, so, ro: (ro[j], 0, 0)),   # receiver b block
        ],
        out_specs=(
            pl.BlockSpec((1, 1, 1, RD), lambda i, j, so, ro: (i, j, 0, 0)),  # SSE partials
            pl.BlockSpec((1, 1, B, RD), lambda i, j, so, ro: (i, j, 0, 0)),  # recon (bf16)
        ),
        scratch_shapes=[pltpu.VMEM((B, V), jnp.bfloat16)],   # cached message per sender
    )

    sse, recon_packed = pl.pallas_call(
        _population_game_kernel,
        out_shape=(
            jax.ShapeDtypeStruct((n_outer, n_inner, 1, RD), jnp.float32),
            jax.ShapeDtypeStruct((n_outer, n_inner, B, RD), jnp.bfloat16),
        ),
        grid_spec=grid_spec,
        compiler_params=pltpu.CompilerParams(
            # Senders are independent -> both v7x TCs get work; the receiver
            # axis carries the cached message -> "arbitrary".
            dimension_semantics=("parallel", "arbitrary"),
        ),
    )(sender_order, recv_block_order,
      x, w_send_bf16, b_send, w_recv_packed, b_recv_packed)

    # Tiny final reductions / unpacking outside the kernel.
    sse = sse.reshape(n_outer, n_inner, r_blk, D)
    losses = (jnp.sum(sse, axis=-1) / jnp.float32(B * D)).reshape(-1)
    recons = (recon_packed.reshape(n_outer, n_inner, B, r_blk, D)
              .transpose(0, 1, 3, 2, 4)
              .reshape(n_outer * n_inner * r_blk, B, D))
    return losses, recons


# --------------------------- Population wrapper -----------------------------

class PopulationGame:
    """JAX/Pallas mirror of egg.core.population.PopulationGame.

    The original module calls `agents_loss_sampler()` once per forward and
    runs one (sender, receiver, loss) game.  Here the deterministic full-sweep
    sampler returns a scalar-prefetched schedule and one fused pallas_call
    runs every scheduled game (per-step semantics identical; launch overhead,
    sender recomputation and redundant weight DMAs are amortized).
    """

    def __init__(self, game, agents_loss_sampler):
        self.game = game
        self.agents_loss_sampler = agents_loss_sampler

    def __call__(self, *args, **kwargs):
        sender_order, recv_block_order = self.agents_loss_sampler()
        return self.game(sender_order, recv_block_order, *args, **kwargs)


def make_full_sweep_sampler(n_senders, n_receivers, n_losses, r_blk):
    """One epoch of egg's FullSweepAgentSampler (itertools product), expressed
    as (sender_order, receiver_block_order) schedules for the 2-D grid.
    Loss selection is static (fused MSE)."""
    assert n_receivers % r_blk == 0
    sender_order = jnp.arange(n_senders, dtype=jnp.int32)
    recv_block_order = jnp.arange(n_receivers // r_blk, dtype=jnp.int32)

    def sampler():
        return sender_order, recv_block_order

    triples = list(itertools.product(range(n_senders),
                                     range(n_receivers),
                                     range(n_losses)))
    return sampler, triples


# --------------------------------- main -------------------------------------

if __name__ == "__main__":
    # Lane-dense, MXU-friendly sizes: batch fills >=128 MXU rows, feature and
    # vocab dims are exact multiples of the 128-wide lane axis.
    B, D, V = 128, 128, 128
    N_SENDERS, N_RECEIVERS, R_BLK = 2, 4, 2

    key = jax.random.PRNGKey(0)
    k = jax.random.split(key, 5)
    x = jax.random.normal(k[0], (B, D), dtype=jnp.float32)

    # Stacked population of deterministically-initialized linear agents.
    w_send = jax.random.normal(k[1], (N_SENDERS, D, V), jnp.float32) * 0.05
    b_send = jax.random.normal(k[2], (N_SENDERS, 1, V), jnp.float32) * 0.01
    w_recv = jax.random.normal(k[3], (N_RECEIVERS, V, D), jnp.float32) * 0.05
    b_recv = jax.random.normal(k[4], (N_RECEIVERS, 1, D), jnp.float32) * 0.01
    losses_names = ["mse"]   # loss selection is static; MSE is fused in-kernel

    sampler, triples = make_full_sweep_sampler(
        N_SENDERS, N_RECEIVERS, len(losses_names), R_BLK)

    @jax.jit
    def game(sender_order, recv_block_order, x_in):
        return population_game_sweep(x_in, w_send, b_send, w_recv, b_recv,
                                     sender_order, recv_block_order, r_blk=R_BLK)

    population_game = PopulationGame(game, sampler)

    losses, recons = population_game(x)
    jax.block_until_ready((losses, recons))

    # Pure-JAX f32 reference for every scheduled (sender, receiver) pair.
    # Tolerances account for bf16 matmul operands / bf16 recon writeback.
    for step, (si, ri, _li) in enumerate(triples):
        logits = x @ w_send[si] + b_send[si]
        msg = jax.nn.softmax(logits, axis=-1)
        recon_ref = msg @ w_recv[ri] + b_recv[ri]
        loss_ref = jnp.mean((recon_ref - x) ** 2)
        assert jnp.allclose(recons[step].astype(jnp.float32), recon_ref,
                            atol=5e-3, rtol=5e-3), f"recon mismatch at step {step}"
        assert jnp.allclose(losses[step], loss_ref,
                            atol=1e-3, rtol=1e-3), f"loss mismatch at step {step}"

    print("KERNEL_OK")
</pallas_src>

<mosaic_0001>
module attributes {stable_mosaic.version = 11 : i64} {
  func.func @_population_game_kernel(%arg0: i32, %arg1: i32, %arg2: memref<2xi32, #tpu.memory_space<smem>>, %arg3: memref<2xi32, #tpu.memory_space<smem>>, %arg4: memref<128x128xf32, #tpu.memory_space<vmem>>, %arg5: memref<1x128x128xbf16, #tpu.memory_space<vmem>>, %arg6: memref<1x1x128xf32, #tpu.memory_space<vmem>>, %arg7: memref<1x128x256xbf16, #tpu.memory_space<vmem>>, %arg8: memref<1x1x256xf32, #tpu.memory_space<vmem>>, %arg9: memref<1x1x1x256xf32, #tpu.memory_space<vmem>>, %arg10: memref<1x1x128x256xbf16, #tpu.memory_space<vmem>>, %arg11: memref<128x128xbf16, #tpu.memory_space<vmem>>) attributes {dimension_semantics = [#tpu.dimension_semantics<parallel>, #tpu.dimension_semantics<arbitrary>], iteration_bounds = array<i64: 2, 2>, scalar_prefetch = 2 : i64, scratch_operands = 1 : i64, tpu.core_type = #tpu.core_type<tc>, window_params = [{pipeline_mode = #tpu.pipeline_mode<synchronous>, transform_indices = @transform_0, window_bounds = array<i64: 128, 128>}, {transform_indices = @transform_1, window_bounds = array<i64: 1, 128, 128>}, {transform_indices = @transform_2, window_bounds = array<i64: 1, 1, 128>}, {transform_indices = @transform_3, window_bounds = array<i64: 1, 128, 256>}, {transform_indices = @transform_4, window_bounds = array<i64: 1, 1, 256>}, {transform_indices = @transform_5, window_bounds = array<i64: 1, 1, 1, 256>}, {transform_indices = @transform_6, window_bounds = array<i64: 1, 1, 128, 256>}]} {
    %c0_i32 = arith.constant 0 : i32
    %0 = arith.cmpi eq, %arg1, %c0_i32 : i32
    %1 = arith.extui %0 : i1 to i32
    %c0_i32_0 = arith.constant 0 : i32
    %2 = arith.cmpi ne, %1, %c0_i32_0 : i32
    scf.if %2 {
      %c0_19 = arith.constant 0 : index
      %c0_20 = arith.constant 0 : index
      %24 = vector.load %arg4[%c0_19, %c0_20] : memref<128x128xf32, #tpu.memory_space<vmem>>, vector<128x128xf32>
      %25 = arith.truncf %24 : vector<128x128xf32> to vector<128x128xbf16>
      %c0_21 = arith.constant 0 : index
      %c0_22 = arith.constant 0 : index
      %c0_23 = arith.constant 0 : index
      %26 = vector.load %arg5[%c0_21, %c0_22, %c0_23] : memref<1x128x128xbf16, #tpu.memory_space<vmem>>, vector<1x128x128xbf16>
      %27 = vector.shape_cast %26 : vector<1x128x128xbf16> to vector<128x128xbf16>
      %cst_24 = arith.constant dense<0.000000e+00> : vector<128x128xf32>
      %28 = tpu.matmul %25, %27, %cst_24 {dimension_numbers = #tpu.dot_dimension_numbers<[1], [0], [0], [1], [0, 0, 1, 1], [], []>} : vector<128x128xbf16>, vector<128x128xbf16>, vector<128x128xf32> -> vector<128x128xf32>
      %c0_25 = arith.constant 0 : index
      %c0_26 = arith.constant 0 : index
      %c0_27 = arith.constant 0 : index
      %29 = vector.load %arg6[%c0_25, %c0_26, %c0_27] : memref<1x1x128xf32, #tpu.memory_space<vmem>>, vector<1x1x128xf32>
      %30 = vector.shape_cast %29 : vector<1x1x128xf32> to vector<1x128xf32>
      %31 = vector.broadcast %30 : vector<1x128xf32> to vector<128x128xf32>
      %32 = arith.addf %28, %31 : vector<128x128xf32>
      %cst_28 = arith.constant dense<0xFF800000> : vector<128xf32>
      %33 = vector.multi_reduction <maximumf>, %32, %cst_28 [1] : vector<128x128xf32> to vector<128xf32>
      %34 = vector.shape_cast %33 : vector<128xf32> to vector<128x1xf32>
      %35 = vector.broadcast %34 : vector<128x1xf32> to vector<128x128xf32>
      %36 = arith.subf %32, %35 : vector<128x128xf32>
      %37 = math.exp %36 : vector<128x128xf32>
      %cst_29 = arith.constant dense<0.000000e+00> : vector<128xf32>
      %38 = vector.multi_reduction <add>, %37, %cst_29 [1] : vector<128x128xf32> to vector<128xf32>
      %39 = vector.shape_cast %38 : vector<128xf32> to vector<128x1xf32>
      %40 = vector.broadcast %39 : vector<128x1xf32> to vector<128x128xf32>
      %41 = arith.divf %37, %40 : vector<128x128xf32>
      %42 = arith.truncf %41 : vector<128x128xf32> to vector<128x128xbf16>
      %c0_30 = arith.constant 0 : index
      %c0_31 = arith.constant 0 : index
      %43 = vector.load %arg11[%c0_30, %c0_31] : memref<128x128xbf16, #tpu.memory_space<vmem>>, vector<128x128xbf16>
      tpu.vector_store %arg11[%c0_30, %c0_31], %42 {strides = array<i32>} : memref<128x128xbf16, #tpu.memory_space<vmem>>, vector<128x128xbf16>,
    } else {
    }
    %c0 = arith.constant 0 : index
    %c0_1 = arith.constant 0 : index
    %3 = vector.load %arg11[%c0, %c0_1] : memref<128x128xbf16, #tpu.memory_space<vmem>>, vector<128x128xbf16>
    %c0_2 = arith.constant 0 : index
    %c0_3 = arith.constant 0 : index
    %c0_4 = arith.constant 0 : index
    %4 = vector.load %arg7[%c0_2, %c0_3, %c0_4] : memref<1x128x256xbf16, #tpu.memory_space<vmem>>, vector<1x128x256xbf16>
    %5 = vector.shape_cast %4 : vector<1x128x256xbf16> to vector<128x256xbf16>
    %cst = arith.constant dense<0.000000e+00> : vector<128x256xf32>
    %6 = tpu.matmul %3, %5, %cst {dimension_numbers = #tpu.dot_dimension_numbers<[1], [0], [0], [1], [0, 0, 1, 1], [], []>} : vector<128x128xbf16>, vector<128x256xbf16>, vector<128x256xf32> -> vector<128x256xf32>
    %c0_5 = arith.constant 0 : index
    %c0_6 = arith.constant 0 : index
    %c0_7 = arith.constant 0 : index
    %7 = vector.load %arg8[%c0_5, %c0_6, %c0_7] : memref<1x1x256xf32, #tpu.memory_space<vmem>>, vector<1x1x256xf32>
    %8 = vector.shape_cast %7 : vector<1x1x256xf32> to vector<1x256xf32>
    %9 = vector.broadcast %8 : vector<1x256xf32> to vector<128x256xf32>
    %10 = arith.addf %6, %9 : vector<128x256xf32>
    %11 = arith.truncf %10 : vector<128x256xf32> to vector<128x256xbf16>
    %c0_8 = arith.constant 0 : index
    %c0_9 = arith.constant 0 : index
    %c0_10 = arith.constant 0 : index
    %c0_11 = arith.constant 0 : index
    %12 = vector.load %arg10[%c0_8, %c0_9, %c0_10, %c0_11] : memref<1x1x128x256xbf16, #tpu.memory_space<vmem>>, vector<1x1x128x256xbf16>
    %13 = vector.shape_cast %12 : vector<1x1x128x256xbf16> to vector<128x256xbf16>
    %14 = vector.shape_cast %11 : vector<128x256xbf16> to vector<1x1x128x256xbf16>
    tpu.vector_store %arg10[%c0_8, %c0_9, %c0_10, %c0_11], %14 {strides = array<i32>} : memref<1x1x128x256xbf16, #tpu.memory_space<vmem>>, vector<1x1x128x256xbf16>,
    %c0_12 = arith.constant 0 : index
    %c0_13 = arith.constant 0 : index
    %15 = vector.load %arg4[%c0_12, %c0_13] : memref<128x128xf32, #tpu.memory_space<vmem>>, vector<128x128xf32>
    %16 = tpu.concatenate %15, %15 in 1 : vector<128x128xf32>, vector<128x128xf32> -> vector<128x256xf32>
    %17 = arith.subf %10, %16 : vector<128x256xf32>
    %18 = arith.mulf %17, %17 : vector<128x256xf32>
    %cst_14 = arith.constant dense<0.000000e+00> : vector<256xf32>
    %19 = vector.multi_reduction <add>, %18, %cst_14 [0] : vector<128x256xf32> to vector<256xf32>
    %20 = vector.shape_cast %19 : vector<256xf32> to vector<1x256xf32>
    %c0_15 = arith.constant 0 : index
    %c0_16 = arith.constant 0 : index
    %c0_17 = arith.constant 0 : index
    %c0_18 = arith.constant 0 : index
    %21 = vector.load %arg9[%c0_15, %c0_16, %c0_17, %c0_18] : memref<1x1x1x256xf32, #tpu.memory_space<vmem>>, vector<1x1x1x256xf32>
    %22 = vector.shape_cast %21 : vector<1x1x1x256xf32> to vector<1x256xf32>
    %23 = vector.shape_cast %20 : vector<1x256xf32> to vector<1x1x1x256xf32>
    tpu.vector_store %arg9[%c0_15, %c0_16, %c0_17, %c0_18], %23 {strides = array<i32>} : memref<1x1x1x256xf32, #tpu.memory_space<vmem>>, vector<1x1x1x256xf32>,
    return
  }
  func.func @transform_0(%arg0: i32, %arg1: i32, %arg2: memref<2xi32, #tpu.memory_space<smem>>, %arg3: memref<2xi32, #tpu.memory_space<smem>>) -> (i32, i32) {
    %c0_i32 = arith.constant 0 : i32
    %c0_i32_0 = arith.constant 0 : i32
    %c0_i32_1 = arith.constant 0 : i32
    return %c0_i32, %c0_i32_0 : i32, i32
  }
  func.func @transform_1(%arg0: i32, %arg1: i32, %arg2: memref<2xi32, #tpu.memory_space<smem>>, %arg3: memref<2xi32, #tpu.memory_space<smem>>) -> (i32, i32, i32) {
    %0 = arith.index_cast %arg0 : i32 to index
    %1 = memref.load %arg2[%0] : memref<2xi32, #tpu.memory_space<smem>>
    %c0_i32 = arith.constant 0 : i32
    %c0_i32_0 = arith.constant 0 : i32
    %c0_i32_1 = arith.constant 0 : i32
    return %1, %c0_i32, %c0_i32_0 : i32, i32, i32
  }
  func.func @transform_2(%arg0: i32, %arg1: i32, %arg2: memref<2xi32, #tpu.memory_space<smem>>, %arg3: memref<2xi32, #tpu.memory_space<smem>>) -> (i32, i32, i32) {
    %0 = arith.index_cast %arg0 : i32 to index
    %1 = memref.load %arg2[%0] : memref<2xi32, #tpu.memory_space<smem>>
    %c0_i32 = arith.constant 0 : i32
    %c0_i32_0 = arith.constant 0 : i32
    %c0_i32_1 = arith.constant 0 : i32
    return %1, %c0_i32, %c0_i32_0 : i32, i32, i32
  }
  func.func @transform_3(%arg0: i32, %arg1: i32, %arg2: memref<2xi32, #tpu.memory_space<smem>>, %arg3: memref<2xi32, #tpu.memory_space<smem>>) -> (i32, i32, i32) {
    %0 = arith.index_cast %arg1 : i32 to index
    %1 = memref.load %arg3[%0] : memref<2xi32, #tpu.memory_space<smem>>
    %c0_i32 = arith.constant 0 : i32
    %c0_i32_0 = arith.constant 0 : i32
    %c0_i32_1 = arith.constant 0 : i32
    return %1, %c0_i32, %c0_i32_0 : i32, i32, i32
  }
  func.func @transform_4(%arg0: i32, %arg1: i32, %arg2: memref<2xi32, #tpu.memory_space<smem>>, %arg3: memref<2xi32, #tpu.memory_space<smem>>) -> (i32, i32, i32) {
    %0 = arith.index_cast %arg1 : i32 to index
    %1 = memref.load %arg3[%0] : memref<2xi32, #tpu.memory_space<smem>>
    %c0_i32 = arith.constant 0 : i32
    %c0_i32_0 = arith.constant 0 : i32
    %c0_i32_1 = arith.constant 0 : i32
    return %1, %c0_i32, %c0_i32_0 : i32, i32, i32
  }
  func.func @transform_5(%arg0: i32, %arg1: i32, %arg2: memref<2xi32, #tpu.memory_space<smem>>, %arg3: memref<2xi32, #tpu.memory_space<smem>>) -> (i32, i32, i32, i32) {
    %c0_i32 = arith.constant 0 : i32
    %c0_i32_0 = arith.constant 0 : i32
    %c0_i32_1 = arith.constant 0 : i32
    return %arg0, %arg1, %c0_i32, %c0_i32_0 : i32, i32, i32, i32
  }
  func.func @transform_6(%arg0: i32, %arg1: i32, %arg2: memref<2xi32, #tpu.memory_space<smem>>, %arg3: memref<2xi32, #tpu.memory_space<smem>>) -> (i32, i32, i32, i32) {
    %c0_i32 = arith.constant 0 : i32
    %c0_i32_0 = arith.constant 0 : i32
    %c0_i32_1 = arith.constant 0 : i32
    return %arg0, %arg1, %c0_i32, %c0_i32_0 : i32, i32, i32, i32
  }
}

</mosaic_0001>

<bundles_post_ra>
// kernel: game.1
= control target key start
LH: loop header
LB: loop body
LE: loop exit
PB: predicated region body
PF: predicated region fallthrough
CT: control target
= control target key end

     0   :  { %s2276_s27 = smov [#allocation4]   ;;  %s2893_s0 = inlined_call_operand.hbm [shape: s32[2], index: 0, kind: input, shape index: {}]   ;;  %s2894_s2 = inlined_call_operand.hbm [shape: f32[128,128], index: 2, kind: input, shape index: {}]   ;;  %s2895_s3 = inlined_call_operand.hbm [shape: bf16[2,128,128], index: 3, kind: input, shape index: {}]   ;;  %s2896_s4 = inlined_call_operand.vmem [shape: f32[2,1,128], index: 4, kind: input, shape index: {}]   ;;  %s2897_s5 = inlined_call_operand.hbm [shape: bf16[2,128,256], index: 5, kind: input, shape index: {}]   ;;  %s2898_s6 = inlined_call_operand.vmem [shape: f32[2,1,256], index: 6, kind: input, shape index: {}]   ;;  %s2899_s7 = inlined_call_operand.vmem [shape: f32[2,2,1,256], index: 7, kind: output, shape index: {0}]   ;;  %s2900_s8 = inlined_call_operand.vmem [shape: bf16[2,2,128,256], index: 8, kind: output, shape index: {1}]   ;;  %s2901_s1 = inlined_call_operand.vmem [shape: s32[2], index: 1, kind: input, shape index: {}]  }
   0x1   :  { %2915 = sst [smem:[#allocation25_spill]] %s2894_s2  ;;  %s16_s10 = sshll.u32 %s2901_s1, 4  ;;  %s17_s10 = int_to_ptr.vmem [resolvable:$true] %s16_s10 }
   0x2   :  { %2916 = sst [smem:[#allocation26_spill]] %s2895_s3  ;;  %s2080_s11 = scalar_lea.vmem %s17_s10, 16 }
   0x3   :  { %2917 = sst [smem:[#allocation27_spill]] %s2896_s4  ;;  %p2081_p0 = scmp.ne.s32.totalorder %s17_s10, %s2080_s11 }
   0x4   :  { %2918 = sst [smem:[#allocation28_spill]] %s2897_s5  ;;  %p2085_p1 = scmp.lt.s32.totalorder %s17_s10, %s17_s10 }
   0x5   :  { %2919 = sst [smem:[#allocation29_spill]] %s2898_s6  ;;  %p2086_p2 = scmp.lt.s32.totalorder %s2080_s11, %s2080_s11 }
   0x6   :  { %2920 = sst [smem:[#allocation30_spill]] %s2899_s7 }
   0x7   :  { %2921 = sst [smem:[#allocation31_spill]] %s2900_s8  ;;  %p2087_p3 = por %p2086_p2, %p2085_p1 }
   0x8   :  { %15 = dma.hbm_to_smem %s2893_s0, 16, %s2276_s27, [#allocation3] }
   0x9   :  { %p2088_p4 = pnand %p2087_p3, %p2081_p0 }
   0xb   :  { %2091 = shalt.err (!%p2088_p4)  }
   0xc   :  { %s2277_s12 = smov [#allocation5]  }
   0xd   :  { %19 = dma.vmem_to_smem %s17_s10, 16, %s2277_s12, [#allocation3] }
   0xe   :  { %2218 = dma.done.wait [#allocation3], 32 }
   0xf   :  { %2219 = vsyncadd [#allocation3], 4294967264 }
  0x10   :  { %21 = sfence }
  0x11   :  { %22 = vsyncpa [#allocation7], 0 }
  0x12   :  { %23 = vsyncpa [#allocation9], 0 }
  0x13   :  { %25 = vsyncpa [#allocation9 + $0x1], 0  ;;  %s2338_s0 = smov 0   ;;  %s2340_s13 = smov 0  }
  0x14   :  { %s2342_s1 = smov 0   ;;  %s2344_s14 = smov 0  }
  0x15   :  { %s2346_s15 = smov 0   ;;  %s2348_s16 = smov 0  }
  0x16   :  { %s2350_s17 = smov 0   ;;  %s2352_s18 = smov 0  }
  0x17   :  { %s2354_s19 = smov 0   ;;  %s2356_s20 = smov 0  }
  0x18   :  { %s2358_s21 = smov 0  }
  0x19 LB: > { %2922 = sst [smem:[#allocation19_spill]] %s2258_s17  ;;  %s40_s22 = sadd.s32 1, %s2266_s19  ;;  %s2274_s21 = sphi %s2358_s21, %s31_s21   ;;  %s2270_s20 = sphi %s2356_s20, %s2959_s20   ;;  %s2266_s19 = sphi %s2354_s19, %s2958_s19   ;;  %s2262_s18 = sphi %s2352_s18, %s2957_s18   ;;  %s2258_s17 = sphi %s2350_s17, %s2956_s17   ;;  %s2254_s16 = sphi %s2348_s16, %s2965_s16   ;;  %s2250_s15 = sphi %s2346_s15, %s2964_s15   ;;  %s2246_s14 = sphi %s2344_s14, %s2963_s14   ;;  %s2242_s1 = sphi %s2342_s1, %s2962_s1   ;;  %s2238_s13 = sphi %s2340_s13, %s2961_s13   ;;  %s2234_s0 = sphi %s2338_s0, %s2960_s0  }
  0x1a   : > { %2923 = sst [smem:[#allocation20_spill]] %s2266_s19  ;;  %s43_s23 = sadd.s32 1, %s2270_s20 }
  0x1b   : > { %2924 = sst [smem:[#allocation21_spill]] %s2270_s20  ;;  %p41_p5 = scmp.ge.s32.totalorder %s40_s22, 2 }
  0x1c   : > { %s68_s24 = sld [smem:[#allocation4 + %s2270_s20]]  ;;  %s73_s25 = sadd.s32 1, %s2254_s16 }
  0x1d   : > { %p80_p6 = scmp.ne.s32.totalorder %s2254_s16, %s2250_s15  ;;  %s2967_s22 = smov (%p41_p5, %s40_s22), 0 }
  0x1e   : > { %2925 = sst [smem:[#allocation22_spill]] %s2967_s22  ;;  %s2969_s23 = smov (!%p41_p5, %s43_s23), %s2270_s20 }
  0x1f   : > { %p2906_p7 = scmp.eq.s32.totalorder %s2274_s21, 0  ;;  %s2404_s26 = sld [smem:[#allocation5 + %s2967_s22]] }
  0x20   : > { %p45_p8 = scmp.ge.s32.totalorder %s2969_s23, 2  ;;  %p2905_p10 = scmp.lt.s32.totalorder %s2274_s21, 4 }
  0x21   : > { %p2408_p9 = por %p2906_p7, %p80_p6  ;;  %s263_s28 = sand.u32 1, %s2274_s21  }
  0x22   : > { %s2971_s23 = smov (%p45_p8, %s2969_s23), 0  ;;  %s265_s29 = sand.u32 1, %s2254_s16  }
  0x23   : > { %2927 = sst [smem:[#allocation23_spill]] %s2971_s23  ;;  %s1596_s9 = sshll.u32 %s265_s29, 6 }
  0x24   : > { %s69_s30 = sld [smem:[#allocation4 + %s2971_s23]]  ;;  %p2422_p11 = pnand %p2905_p10, %p2408_p9 }
  0x25   : > { %s1843_s11 = scalar_select %p2408_p9, [#allocation4], [#allocation11] }
  0x26   : > { %s1844_s12 = scalar_select %p2408_p9, %s2270_s20, 0 }
  0x27   : > { %s2973_s11 = smov (!%p2905_p10, %s1843_s11), [#allocation13]  ;;  %s267_s8 = scalar_lea.vmem [#allocation8], %s1596_s9 }
  0x28   : > { %s275_s6 = sshll.u32 %s267_s8, 4  ;;  %s2975_s12 = smov (!%p2905_p10, %s1844_s12), 0  ;;  %s2433_s6 = int_to_ptr.vmem [resolvable:$true] %s275_s6 }
  0x29   : > { %s268_s23 = sld [smem:[%s2973_s11 + %s2975_s12]]  ;;  %p2094_p0 = pneg %p2422_p11 }
  0x2a   : > { %s70_s22 = ssub.s32 %s68_s24, %s69_s30  ;;  %s2930_s3 = sld [smem:[#allocation26_spill]] }
  0x2b   : > { %p71_p12 = scmp.eq.s32.totalorder %s70_s22, 0  ;;  %s2908_s24 = sadd.s32 4294967295, %s2274_s21  }
  0x2c   : > { %s2446_s30 = scalar_lea.sflag [#allocation9], %s263_s28 }
  0x2d   : > { %s2438_s29 = scalar_select %p71_p12, %s2254_s16, %s73_s25  }
  0x2f   : > { %2929 = sst [smem:[#allocation24_spill]] %s2438_s29  ;;  %s1680_s4 = sshll.u32 %s268_s23, 10 }
  0x30   : > { %s2443_s27 = scalar_lea.hbm %s2930_s3, %s1680_s4  ;;  %s2097_s23 = scalar_lea.hbm %s2930_s3, 2048 }
  0x31   : > { %s2092_s8 = scalar_lea.hbm %s2443_s27, 1024  ;;  %p2098_p3 = scmp.lt.s32.totalorder %s2443_s27, %s2930_s3 }
  0x32   : > { %p2093_p13 = scmp.ne.s32.totalorder %s2443_s27, %s2092_s8  ;;  %p2099_p4 = scmp.lt.s32.totalorder %s2097_s23, %s2092_s8 }
  0x34   : > { %p2095_p1 = pnand %p2094_p0, %p2093_p13  ;;  %p2100_p5 = por %p2099_p4, %p2098_p3 }
  0x36   : > { %p2096_p2 = pneg %p2095_p1 }
  0x38   : > { %p2101_p6 = pnand %p2100_p5, %p2096_p2 }
  0x3a   : > { %2104 = shalt.err (!%p2101_p6)
}
  0x3b   : > { %s2105_s4 = scalar_lea.vmem %s2433_s6, 1024  ;;  %s2278_s17 = smov [#allocation8]  }
  0x3c   : > { %p2106_p8 = scmp.ne.s32.totalorder %s2433_s6, %s2105_s4  ;;  %s2110_s28 = sshll.u32 %s2278_s17, 4  ;;  %s2111_s28 = int_to_ptr.vmem [resolvable:$false] %s2110_s28 }
  0x3d   : > { %s2112_s11 = scalar_lea.vmem %s2111_s28, 2048  ;;  %p2113_p13 = scmp.lt.s32.totalorder %s2433_s6, %s2111_s28 }
  0x3e   : > { %p2108_p9 = pnand %p2106_p8, %p2094_p0  ;;  %p2114_p1 = scmp.lt.s32.totalorder %s2112_s11, %s2105_s4 }
  0x40   : > { %p2109_p12 = pneg %p2108_p9  ;;  %p2115_p10 = por %p2114_p1, %p2113_p13 }
  0x42   : > { %p2116_p7 = pnand %p2115_p10, %p2109_p12 }
  0x44   : > { %2119 = shalt.err (!%p2116_p7)
}
  0x45   : > { %s2279_s12 = smov 64   ;;  %s2280_s8 = smov 4  }
  0x46   : > { %1862 = dma.hbm_to_vmem [thread:$0]  (!%p2422_p11), %s2443_s27, 1024, %s2433_s6, %s2446_s30, %s2279_s12, %s2279_s12, %s2280_s8  }
  0x47   : > { %p86_p10 = scmp.ne.s32.totalorder %s2250_s15, %s2246_s14  ;;  %p2471_p7 = scmp.eq.s32.totalorder %s2908_s24, 0 }
  0x48   : > { %p142_p0 = scmp.ne.s32.totalorder %s2238_s13, %s2234_s0  ;;  %p1593_p2 = scmp.ge.s32.totalorder %s2274_s21, 1 }
  0x49   : > { %s2931_s22 = scalar_select %p2471_p7, 1, 0 }
  0x4a   : > { %p2480_p3 = por %p2471_p7, %p86_p10  ;;  %p237_p4 = scmp.lt.s32.totalorder %s2274_s21, 5 }
  0x4b   : > { %p2487_p5 = por %p142_p0, %p2471_p7  ;;  %s2281_s10 = smov [#allocation6]  }
  0x4c   : > { %s2932_s25 = scalar_select %p2480_p3, 1, 0 }
  0x4d   : > { %s2933_s6 = scalar_select %p2487_p5, 1, 0 }
  0x4e   : > { %p2491_p11 = pnand %p1593_p2, %p237_p4  ;;  %s249_s27 = sshll.u32 %s2281_s10, 4  ;;  %s250_s27 = int_to_ptr.vmem [resolvable:$true] %s249_s27 }
  0x4f   : > { %s124_s23 = sld [smem:[#allocation5 + %s2266_s19]]  ;;  %p136_p9 = scmp.ne.s32.totalorder %s2242_s1, %s2238_s13 }
  0x50   : > { %s2934_s14 = scalar_select %p2491_p11, 1, 0 }
  0x51   : > { %p1853_p6 = pneg %p2491_p11  ;;  %s2131_s9 = scalar_lea.vmem %s250_s27, 2048 }
  0x52   : > { %p2132_p13 = scmp.ne.s32.totalorder %s250_s27, %s2131_s9  ;;  %p2139_p0 = scmp.lt.s32.totalorder %s250_s27, %s250_s27 }
  0x53   : > { %p2499_p8 = pnand %p1853_p6, %p2471_p7  ;;  %p2140_p2 = scmp.lt.s32.totalorder %s2131_s9, %s2131_s9 }
  0x55   : > { %p2122_p12 = pneg %p2499_p8  ;;  %p2141_p4 = por %p2140_p2, %p2139_p0 }
  0x57   : > { %p2134_p1 = pnand %p2132_p13, %p2122_p12 }
  0x59   : > { %p2135_p10 = pneg %p2134_p1 }
  0x5b   : > { %p2142_p5 = pnand %p2141_p4, %p2135_p10 }
  0x5d   : > { %2145 = shalt.err (!%p2142_p5)
}
  0x5e   : > { %s2282_s7 = smov 128   ;;  %s2283_s4 = smov 8  }
  0x5f   : > { %s2936_s2 = sld [smem:[#allocation25_spill]]  ;;  %s295_s11 = sand.u32 1, %s2242_s1  }
  0x60   : > { %p2937_p5 = scmp.eq.s32.totalorder %s2274_s21, 0  ;;  %s129_s12 = sadd.s32 1, %s2242_s1 }
  0x61   : > { %s126_s8 = ssub.s32 %s124_s23, %s2404_s26  ;;  %s1599_s10 = sshll.u32 %s295_s11, 7 }
  0x62   : > { %p138_p6 = por %p136_p9, %p2937_p5  ;;  %p127_p12 = scmp.eq.s32.totalorder %s126_s8, 0 }
  0x63   : > { %p2938_p13 = scmp.lt.s32.totalorder %s2274_s21, 4  ;;  %s297_s17 = scalar_lea.vmem [#allocation10], %s1599_s10 }
  0x64   : > { %s1846_s0 = scalar_select %p138_p6, [#allocation5], [#allocation12] }
  0x65   : > { %1856 = dma.hbm_to_vmem [thread:$0]  (!%p2499_p8), %s2936_s2, 2048, %s250_s27, [#allocation7], %s2282_s7, %s2282_s7, %s2283_s4  }
  0x66   : > { %p2526_p1 = pnand %p2938_p13, %p138_p6  ;;  %p2940_p10 = pmov %p2938_p13 }
  0x67   : > { %s2531_s24 = scalar_select %p127_p12, %s2242_s1, %s129_s12  }
  0x68   : > { %s1847_s3 = scalar_select %p138_p6, %s2266_s19, 0 }
  0x69   : > { %s2977_s0 = smov (!%p2940_p10, %s1846_s0), [#allocation14]  ;;  %p2941_p8 = pmov %p2940_p10 }
  0x6a   : > { %s305_s28 = sshll.u32 %s297_s17, 4  ;;  %s2942_s5 = sld [smem:[#allocation28_spill]]  ;;  %s2538_s28 = int_to_ptr.vmem [resolvable:$true] %s305_s28 }
  0x6b   : > { %s2979_s3 = smov (!%p2941_p8, %s1847_s3), 0  ;;  %p2148_p0 = pneg %p2526_p1 }
  0x6c   : > { %s298_s27 = sld [smem:[%s2977_s0 + %s2979_s3]] }
  0x70   : > { %s2151_s0 = scalar_lea.hbm %s2942_s5, 4096 }
  0x72   : > { %s1681_s26 = sshll.u32 %s298_s27, 11 }
  0x73   : > { %s2543_s8 = scalar_lea.hbm %s2942_s5, %s1681_s26 }
  0x74   : > { %s2146_s12 = scalar_lea.hbm %s2543_s8, 2048  ;;  %p2152_p5 = scmp.lt.s32.totalorder %s2543_s8, %s2942_s5 }
  0x75   : > { %p2147_p9 = scmp.ne.s32.totalorder %s2543_s8, %s2146_s12  ;;  %p2153_p6 = scmp.lt.s32.totalorder %s2151_s0, %s2146_s12 }
  0x77   : > { %p2149_p2 = pnand %p2148_p0, %p2147_p9  ;;  %p2154_p12 = por %p2153_p6, %p2152_p5 }
  0x79   : > { %p2150_p4 = pneg %p2149_p2 }
  0x7b   : > { %p2155_p13 = pnand %p2154_p12, %p2150_p4 }
  0x7d   : > { %2158 = shalt.err (!%p2155_p13)
}
  0x7e   : > { %s2159_s26 = scalar_lea.vmem %s2538_s28, 2048  ;;  %s2284_s23 = smov [#allocation10]  }
  0x7f   : > { %p2160_p10 = scmp.ne.s32.totalorder %s2538_s28, %s2159_s26  ;;  %s2164_s11 = sshll.u32 %s2284_s23, 4  ;;  %s2165_s11 = int_to_ptr.vmem [resolvable:$false] %s2164_s11 }
  0x80   : > { %s2166_s3 = scalar_lea.vmem %s2165_s11, 4096  ;;  %p2167_p2 = scmp.lt.s32.totalorder %s2538_s28, %s2165_s11 }
  0x81   : > { %p2162_p8 = pnand %p2160_p10, %p2148_p0  ;;  %p2168_p3 = scmp.lt.s32.totalorder %s2166_s3, %s2159_s26 }
  0x83   : > { %p2163_p9 = pneg %p2162_p8  ;;  %p2169_p7 = por %p2168_p3, %p2167_p2 }
  0x85   : > { %p2170_p11 = pnand %p2169_p7, %p2163_p9 }
  0x87   : > { %2173 = shalt.err (!%p2170_p11)
}
  0x88   : > { %1867 = dma.hbm_to_vmem [thread:$0]  (!%p2526_p1), %s2543_s8, 2048, %s2538_s28, %s2446_s30, %s2282_s7, %s2282_s7, %s2283_s4  }
  0x89   : > { %p2943_p0 = scmp.ne.s32.totalorder %s2934_s14, 0 }
  0x8a   : > { %p2944_p4 = scmp.ne.s32.totalorder (!%p2943_p0), %s2931_s22, 0 }
  0x8b   : > { %326 = sbr.rel (%p2943_p0) target bundleno = 1049 (0x419), region = 40 }
  0x90   : > { %2221 = dma.done.wait (%p2944_p4), [#allocation7], 2048  }
  0x91   : > { %2223 = vsyncadd (%p2944_p4), [#allocation7], 4294965248  ;;  %s2945_s12 = sadd.s32 4294967295, %s2274_s21   ;;  %s334_s10 = sand.u32 1, %s2250_s15  }
  0x92   : > { %s332_s9 = sand.u32 1, %s2945_s12   ;;  %s1604_s0 = sshll.u32 %s334_s10, 6 }
  0x93   : > { %s333_s17 = scalar_lea.sflag [#allocation9], %s332_s9  ;;  %s2576_s27 = scalar_lea.vmem [#allocation8], %s1604_s0 }
  0x94   : > { %p2946_p7 = scmp.ne.s32.totalorder %s2932_s25, 0 }
  0x96   : > { %2225 = dma.done.wait (%p2946_p7), %s333_s17, 1024  }
  0x97   : > { %2227 = vsyncadd (%p2946_p7), %s333_s17, 4294966272  ;;  %s343_s30 = sand.u32 1, %s2238_s13   ;;  %p2947_p3 = scmp.ne.s32.totalorder %s2933_s6, 0 }
  0x98   : > { %s1605_s22 = sshll.u32 %s343_s30, 7 }
  0x99   : > { %s2583_s14 = scalar_lea.vmem [#allocation10], %s1605_s22 }
  0x9a   : > { %2229 = dma.done.wait (%p2947_p3), %s333_s17, 2048  }
  0x9b   : > { %2231 = vsyncadd (%p2947_p3), %s333_s17, 4294965248  ;;  %s2948_s7 = sld [smem:[#allocation19_spill]]  ;;  %p413_p11 = scmp.lt.s32.totalorder %s2262_s18, 1 }
  0x9c   : > { %s401_s25 = sld [smem:[#allocation4 + %s2262_s18]] }
  0x9d   : > { %s2981_s18 = smov (!%p413_p11, %s2262_s18), 1  ;;  %s2949_s9 = sld [smem:[#allocation30_spill]] }
  0x9e   : > { %s1608_s8 = sshll.u32 %s2981_s18, 2  ;;  %s1610_s26 = sshll.u32 %s2981_s18, 6 }
  0x9f   : > { %s2950_s30 = sld [smem:[#allocation27_spill]] }
  0xa0   : > { %s2952_s6 = sld [smem:[#allocation31_spill]] }
  0xa1   : > { %p415_p1 = scmp.lt.s32.totalorder %s2948_s7, 1  ;;  %s407_s4 = sld [smem:[#allocation5 + %s2948_s7]] }
  0xa2   : > { %p402_p5 = scmp.lt.s32.totalorder %s401_s25, 1  ;;  %p1612_p12 = scmp.ne.s32.totalorder %s2948_s7, 0 }
  0xa3   : > { %s416_s28 = scalar_select %p415_p1, %s2948_s7, 1 }
  0xa4   : > { %s2983_s25 = smov (!%p402_p5, %s401_s25), 1 }
  0xa5   : > { %s1607_s23 = sshll.u32 %s416_s28, 1  ;;  %s1609_s11 = sshll.u32 %s416_s28, 5 }
  0xa6   : > { %s2595_s3 = sadd.s32 %s1608_s8, %s1607_s23  ;;  %s404_s22 = scalar_lea.vmem %s2950_s30, %s2983_s25 }
  0xa7   : > { %p408_p6 = scmp.lt.s32.totalorder %s407_s4, 1  ;;  %s420_s10 = scalar_lea.vmem %s2949_s9, %s2595_s3 }
  0xa8   : > { %s427_s18 = sadd.s32 %s1610_s26, %s1609_s11  ;;  %s2951_s23 = sld [smem:[#allocation29_spill]] }
  0xa9   : > { %s2985_s4 = smov (!%p408_p6, %s407_s4), 1  ;;  %s1611_s28 = sshll.u32 %s427_s18, 2 }
  0xaa   : > { %s1606_s2 = sshll.u32 %s2985_s4, 1  ;;  %s2615_s12 = scalar_lea.vmem %s2952_s6, %s1611_s28 }
  0xab   : > { %434 = sbr.rel (%p1612_p12) target bundleno = 749 (0x2ed), region = 56 }
  0xae   : > { %s2610_s20 = scalar_lea.vmem %s2951_s23, %s1606_s2 }
  0xb0   : > { %v1968_v0 = vld [vmem:[%s2576_s27 + $0x38] sm:$0xff]   ;;  %v1969_v1 = vld [vmem:[%s2576_s27 + $0x30] sm:$0xff]   ;;  %v1970_v2 = vld [vmem:[%s2576_s27 + $0x28] sm:$0xff]  }
  0xb1   : > { %1777 = vmatprep.subr.bf16.mxu0 %v1968_v0  ;;  %1809 = vmatprep.subr.bf16.mxu1 %v1968_v0  ;;  %v1971_v3 = vld [vmem:[%s2576_s27 + $0x20] sm:$0xff]   ;;  %v436_v5 = vld [vmem:[#allocation6 + $0x8] sm:$0xff]  ;;  %v1972_v10 = vld [vmem:[%s2576_s27 + $0x18] sm:$0xff]  }
  0xb2   : > { %1778 = vmatpush3.bf16.msra.mxu0 %v1968_v0  ;;  %1817 = vmatpush3.bf16.msra.mxu1 %v1968_v0  ;;  %v435_v4 = vld [vmem:[#allocation6] sm:$0xff]  ;;  %v444_v8 = vld [vmem:[#allocation6 + $0x48] sm:$0xff]  ;;  %v1973_v11 = vld [vmem:[%s2576_s27 + $0x10] sm:$0xff]  }
  0xb3   : > { %1779 = vmatprep.subr.bf16.mxu0 %v1969_v1  ;;  %1810 = vmatprep.subr.bf16.mxu1 %v1969_v1  ;;  %v443_v6 = vld [vmem:[#allocation6 + $0x40] sm:$0xff]  ;;  %v451_v7 = vpack.c.bf16 %v436_v5, %v435_v4  ;;  %v1974_v12 = vld [vmem:[%s2576_s27 + $0x8] sm:$0xff]   ;;  %v437_v14 = vld [vmem:[#allocation6 + $0x10] sm:$0xff] }
  0xb4   : > { %v455_v9 = vpack.c.bf16 %v444_v8, %v443_v6  ;;  %v1975_v13 = vld [vmem:[%s2576_s27] sm:$0xff]   ;;  %v438_v15 = vld [vmem:[#allocation6 + $0x18] sm:$0xff]  ;;  %v445_v16 = vld [vmem:[#allocation6 + $0x50] sm:$0xff] }
  0xb5   : > { %1793 = vmatprep.mubr.bf16.mxu0 %v451_v7  ;;  %v446_v17 = vld [vmem:[#allocation6 + $0x58] sm:$0xff]  ;;  %v439_v18 = vld [vmem:[#allocation6 + $0x20] sm:$0xff]  ;;  %v440_v19 = vld [vmem:[#allocation6 + $0x28] sm:$0xff]  ;;  %v452_v22 = vpack.c.bf16 %v438_v15, %v437_v14 }
  0xb6   : > { %1780 = vmatpush3.bf16.msra.mxu0 %v1969_v1  ;;  %1818 = vmatpush3.bf16.msra.mxu1 %v1969_v1  ;;  %v447_v20 = vld [vmem:[#allocation6 + $0x60] sm:$0xff]  ;;  %v448_v21 = vld [vmem:[#allocation6 + $0x68] sm:$0xff]  ;;  %v456_v23 = vpack.c.bf16 %v446_v17, %v445_v16  ;;  %v453_v24 = vpack.c.bf16 %v440_v19, %v439_v18  ;;  %v441_v26 = vld [vmem:[#allocation6 + $0x30] sm:$0xff] }
  0xb7   : > { %1781 = vmatprep.subr.bf16.mxu0 %v1970_v2  ;;  %1811 = vmatprep.subr.bf16.mxu1 %v1970_v2  ;;  %v457_v25 = vpack.c.bf16 %v448_v21, %v447_v20  ;;  %v442_v27 = vld [vmem:[#allocation6 + $0x38] sm:$0xff]  ;;  %v449_v28 = vld [vmem:[#allocation6 + $0x70] sm:$0xff]  ;;  %v1613_v32 = vld [vmem:[%s404_s22] ss:$0 sm:$0xff] }
  0xb8   : > { %1801 = vmatprep.mubr.bf16.mxu1 %v455_v9  ;;  %v450_v29 = vld [vmem:[#allocation6 + $0x78] sm:$0xff]  ;;  %v454_v30 = vpack.c.bf16 %v442_v27, %v441_v26 }
  0xb9   : > { %v458_v31 = vpack.c.bf16 %v450_v29, %v449_v28 }
  0xba   : > { %1782 = vmatpush3.bf16.msra.mxu0 %v1970_v2  ;;  %1819 = vmatpush3.bf16.msra.mxu1 %v1970_v2 }
  0xbb   : > { %1783 = vmatprep.subr.bf16.mxu0 %v1971_v3  ;;  %1812 = vmatprep.subr.bf16.mxu1 %v1971_v3 }
  0xbe   : > { %1784 = vmatpush3.bf16.msra.mxu0 %v1971_v3  ;;  %1820 = vmatpush3.bf16.msra.mxu1 %v1971_v3 }
  0xbf   : > { %1785 = vmatprep.subr.bf16.mxu0 %v1972_v10  ;;  %1813 = vmatprep.subr.bf16.mxu1 %v1972_v10 }
  0xc2   : > { %1786 = vmatpush3.bf16.msra.mxu0 %v1972_v10  ;;  %1821 = vmatpush3.bf16.msra.mxu1 %v1972_v10 }
  0xc3   : > { %1787 = vmatprep.subr.bf16.mxu0 %v1973_v11  ;;  %1814 = vmatprep.subr.bf16.mxu1 %v1973_v11 }
  0xc6   : > { %1788 = vmatpush3.bf16.msra.mxu0 %v1973_v11  ;;  %1822 = vmatpush3.bf16.msra.mxu1 %v1973_v11 }
  0xc7   : > { %1789 = vmatprep.subr.bf16.mxu0 %v1974_v12  ;;  %1815 = vmatprep.subr.bf16.mxu1 %v1974_v12 }
  0xca   : > { %1790 = vmatpush3.bf16.msra.mxu0 %v1974_v12  ;;  %1823 = vmatpush3.bf16.msra.mxu1 %v1974_v12 }
  0xcb   : > { %1791 = vmatprep.subr.bf16.mxu0 %v1975_v13  ;;  %1816 = vmatprep.subr.bf16.mxu1 %v1975_v13 }
  0xce   : > { %1792 = vmatpush3.bf16.msra.mxu0 %v1975_v13  ;;  %1824 = vmatpush3.bf16.msra.mxu1 %v1975_v13 }
  0xd1   : > { %1794 = vmatmul.mubr.bf16.vlgmr.msra.gmra.mxu0 %v452_v22  ;;  %1802 = vmatmul.mubr.bf16.vlgmr.msra.gmra.mxu1 %v456_v23 }
  0xd2   : > { %1797 = vmatprep.mubr.bf16.mxu0 %v453_v24  ;;  %1805 = vmatprep.mubr.bf16.mxu1 %v457_v25 }
  0xd9   : > { %1798 = vmatmul.mubr.bf16.gmra.mxu0 %v454_v30  ;;  %1806 = vmatmul.mubr.bf16.gmra.mxu1 %v458_v31 }
 0x191   : > { %v1795_v33 = vpop.f32.mrf.mxu0  ;;  %v1803_v34 = vpop.f32.mrf.mxu1 }
 0x192   : > { %v573_v35 = vadd.f32 %v1795_v33, %v1613_v32  ;;  %v605_v36 = vadd.f32 %v1803_v34, %v1613_v32 }
 0x193   : > { %v564_v37 = vpop.f32.mrf.mxu0  ;;  %v596_v38 = vpop.f32.mrf.mxu1 }
 0x194   : > { %647 = vmax.xlane.f32.xlu0 %v605_v36  ;;  %631 = vmax.xlane.f32.xlu1 %v573_v35  ;;  %v565_v41 = vadd.f32 %v1613_v32, %v564_v37  ;;  %v597_v46 = vadd.f32 %v1613_v32, %v596_v38 }
 0x195   : > { %v1796_v39 = vpop.f32.mrf.mxu0  ;;  %v1804_v40 = vpop.f32.mrf.mxu1 }
 0x196   : > { %v576_v42 = vadd.f32 %v1796_v39, %v1613_v32  ;;  %v608_v47 = vadd.f32 %v1804_v40, %v1613_v32 }
 0x197   : > { %v567_v43 = vpop.f32.mrf.mxu0  ;;  %v599_v44 = vpop.f32.mrf.mxu1 }
 0x198   : > { %633 = vmax.xlane.f32.xlu1 %v576_v42  ;;  %627 = vmax.xlane.f32.xlu0 %v565_v41  ;;  %v568_v50 = vadd.f32 %v1613_v32, %v567_v43  ;;  %v600_v51 = vadd.f32 %v1613_v32, %v599_v44 }
 0x199   : > { %v1799_v45 = vpop.f32.mrf.mxu0  ;;  %v1807_v49 = vpop.f32.mrf.mxu1 }
 0x19a   : > { %v589_v54 = vadd.f32 %v1799_v45, %v1613_v32  ;;  %v2640_v63 = vadd.f32 %v1807_v49, %v1613_v32 }
 0x19b   : > { %v580_v48 = vpop.f32.mrf.mxu0  ;;  %v612_v53 = vpop.f32.mrf.mxu1 }
 0x19c   : > { %649 = vmax.xlane.f32.xlu1 %v608_v47  ;;  %643 = vmax.xlane.f32.xlu0 %v597_v46  ;;  %v581_v58 = vadd.f32 %v1613_v32, %v580_v48  ;;  %v2634_v61 = vadd.f32 %v1613_v32, %v612_v53 }
 0x19d   : > { %v1800_v52 = vpop.f32.mrf.mxu0  ;;  %v1808_v57 = vpop.f32.mrf.mxu1 }
 0x19e   : > { %v592_v55 = vadd.f32 %v1800_v52, %v1613_v32  ;;  %v2642_v0 = vadd.f32 %v1808_v57, %v1613_v32 }
 0x19f   : > { %v583_v56 = vpop.f32.mrf.mxu0  ;;  %v615_v60 = vpop.f32.mrf.mxu1 }
 0x1a0   : > { %645 = vmax.xlane.f32.xlu1 %v600_v51  ;;  %629 = vmax.xlane.f32.xlu0 %v568_v50  ;;  %v2631_v59 = vadd.f32 %v1613_v32, %v583_v56  ;;  %v2636_v62 = vadd.f32 %v1613_v32, %v615_v60 }
 0x1a4   : > { %641 = vmax.xlane.f32.xlu1 %v592_v55  ;;  %639 = vmax.xlane.f32.xlu0 %v589_v54 }
 0x1a8   : > { %637 = vmax.xlane.f32.xlu1 %v2631_v59  ;;  %635 = vmax.xlane.f32.xlu0 %v581_v58 }
 0x1ac   : > { %653 = vmax.xlane.f32.xlu1 %v2636_v62  ;;  %651 = vmax.xlane.f32.xlu0 %v2634_v61 }
 0x1b0   : > { %657 = vmax.xlane.f32.xlu1 %v2642_v0  ;;  %655 = vmax.xlane.f32.xlu0 %v2640_v63 }
 0x21d   : > { %v648_v1 = vpop.xlane.xlu0 %647  ;;  %v632_v2 = vpop.xlane.xlu1 %631 }
 0x21e   : > { %v661_v3 = vsub.f32 %v573_v35, %v632_v2  ;;  %v669_v4 = vsub.f32 %v605_v36, %v648_v1 }
 0x220   : > { %v679_v5 = vmul.f32 1.442695, %v661_v3  ;;  %v695_v9 = vmul.f32 1.442695, %v669_v4 }
 0x221   : > { %v634_v6 = vpop.xlane.xlu1 %633  ;;  %v628_v7 = vpop.xlane.xlu0 %627 }
 0x222   : > { %v662_v8 = vsub.f32 %v576_v42, %v634_v6  ;;  %1976 = vpow2.f32 %v679_v5  ;;  %v659_v10 = vsub.f32 %v565_v41, %v628_v7 }
 0x224   : > { %v681_v11 = vmul.f32 1.442695, %v662_v8  ;;  %v675_v16 = vmul.f32 1.442695, %v659_v10 }
 0x225   : > { %v650_v12 = vpop.xlane.xlu1 %649  ;;  %v644_v13 = vpop.xlane.xlu0 %643 }
 0x226   : > { %1978 = vpow2.f32 %v681_v11  ;;  %v670_v14 = vsub.f32 %v608_v47, %v650_v12  ;;  %v667_v15 = vsub.f32 %v597_v46, %v644_v13 }
 0x227   : > { %1980 = vpow2.f32 %v695_v9 }
 0x228   : > { %v697_v17 = vmul.f32 1.442695, %v670_v14  ;;  %v691_v20 = vmul.f32 1.442695, %v667_v15 }
 0x229   : > { %v646_v18 = vpop.xlane.xlu1 %645  ;;  %v630_v19 = vpop.xlane.xlu0 %629 }
 0x22a   : > { %1982 = vpow2.f32 %v697_v17  ;;  %v668_v21 = vsub.f32 %v600_v51, %v646_v18  ;;  %v660_v22 = vsub.f32 %v568_v50, %v630_v19 }
 0x22b   : > { %1984 = vpow2.f32 %v675_v16 }
 0x22c   : > { %v677_v23 = vmul.f32 1.442695, %v660_v22  ;;  %1986 = vpow2.f32 %v691_v20  ;;  %v693_v26 = vmul.f32 1.442695, %v668_v21 }
 0x22d   : > { %v642_v24 = vpop.xlane.xlu1 %641  ;;  %v640_v25 = vpop.xlane.xlu0 %639 }
 0x22e   : > { %v666_v27 = vsub.f32 %v592_v55, %v642_v24  ;;  %v665_v28 = vsub.f32 %v589_v54, %v640_v25  ;;  %1988 = vpow2.f32 %v677_v23 }
 0x22f   : > { %v2646_v29 = vpop.eup %1976  ;;  %1990 = vpow2.f32 %v693_v26 }
 0x230   : > { %v687_v30 = vmul.f32 1.442695, %v665_v28  ;;  %711 = vadd.xlane.f32.xlu0 %v2646_v29  ;;  %v689_v33 = vmul.f32 1.442695, %v666_v27 }
 0x231   : > { %v638_v31 = vpop.xlane.xlu1 %637  ;;  %v636_v32 = vpop.xlane.xlu0 %635 }
 0x232   : > { %v664_v34 = vsub.f32 %v2631_v59, %v638_v31  ;;  %v663_v35 = vsub.f32 %v581_v58, %v636_v32  ;;  %1992 = vpow2.f32 %v687_v30 }
 0x233   : > { %v2650_v36 = vpop.eup %1978  ;;  %1994 = vpow2.f32 %v689_v33 }
 0x234   : > { %v2652_v37 = vpop.eup %1980  ;;  %v683_v38 = vmul.f32 1.442695, %v663_v35  ;;  %713 = vadd.xlane.f32.xlu1 %v2650_v36  ;;  %v685_v41 = vmul.f32 1.442695, %v664_v34 }
 0x235   : > { %727 = vadd.xlane.f32.xlu0 %v2652_v37  ;;  %v654_v39 = vpop.xlane.xlu1 %653  ;;  %v652_v40 = vpop.xlane.xlu0 %651 }
 0x236   : > { %v672_v42 = vsub.f32 %v2636_v62, %v654_v39  ;;  %v671_v43 = vsub.f32 %v2634_v61, %v652_v40  ;;  %1996 = vpow2.f32 %v683_v38 }
 0x237   : > { %v2658_v44 = vpop.eup %1982  ;;  %1998 = vpow2.f32 %v685_v41 }
 0x238   : > { %v2660_v45 = vpop.eup %1984  ;;  %v699_v46 = vmul.f32 1.442695, %v671_v43  ;;  %729 = vadd.xlane.f32.xlu1 %v2658_v44  ;;  %v701_v49 = vmul.f32 1.442695, %v672_v42 }
 0x239   : > { %707 = vadd.xlane.f32.xlu0 %v2660_v45  ;;  %v658_v47 = vpop.xlane.xlu1 %657  ;;  %v656_v48 = vpop.xlane.xlu0 %655 }
 0x23a   : > { %v673_v50 = vsub.f32 %v2640_v63, %v656_v48  ;;  %v2665_v51 = vpop.eup %1986  ;;  %2000 = vpow2.f32 %v699_v46  ;;  %v674_v52 = vsub.f32 %v2642_v0, %v658_v47 }
 0x23b   : > { %v2668_v53 = vpop.eup %1988  ;;  %2002 = vpow2.f32 %v701_v49 }
 0x23c   : > { %v703_v54 = vmul.f32 1.442695, %v673_v50  ;;  %709 = vadd.xlane.f32.xlu1 %v2668_v53  ;;  %v2672_v55 = vpop.eup %1990  ;;  %v705_v56 = vmul.f32 1.442695, %v674_v52 }
 0x23d   : > { %723 = vadd.xlane.f32.xlu0 %v2665_v51 }
 0x23e   : > { %2004 = vpow2.f32 %v703_v54 }
 0x23f   : > { %v2674_v57 = vpop.eup %1992  ;;  %2006 = vpow2.f32 %v705_v56 }
 0x240   : > { %725 = vadd.xlane.f32.xlu1 %v2672_v55  ;;  %v2678_v58 = vpop.eup %1994 }
 0x241   : > { %719 = vadd.xlane.f32.xlu0 %v2674_v57 }
 0x243   : > { %v2680_v59 = vpop.eup %1996 }
 0x244   : > { %721 = vadd.xlane.f32.xlu1 %v2678_v58  ;;  %v2684_v60 = vpop.eup %1998 }
 0x245   : > { %715 = vadd.xlane.f32.xlu0 %v2680_v59 }
 0x247   : > { %v2686_v61 = vpop.eup %2000 }
 0x248   : > { %717 = vadd.xlane.f32.xlu1 %v2684_v60  ;;  %v2690_v62 = vpop.eup %2002 }
 0x249   : > { %731 = vadd.xlane.f32.xlu0 %v2686_v61 }
 0x24b   : > { %v2692_v63 = vpop.eup %2004 }
 0x24c   : > { %733 = vadd.xlane.f32.xlu1 %v2690_v62  ;;  %v2696_v0 = vpop.eup %2006 }
 0x24d   : > { %735 = vadd.xlane.f32.xlu0 %v2692_v63 }
 0x250   : > { %737 = vadd.xlane.f32.xlu1 %v2696_v0 }
 0x2b9   : > { %v712_v1 = vpop.xlane.xlu0 %711 }
 0x2ba   : > { %2008 = vrcp.f32 %v712_v1 }
 0x2bd   : > { %v714_v2 = vpop.xlane.xlu1 %713 }
 0x2be   : > { %2010 = vrcp.f32 %v714_v2  ;;  %v728_v3 = vpop.xlane.xlu0 %727 }
 0x2bf   : > { %2012 = vrcp.f32 %v728_v3 }
 0x2c1   : > { %v730_v4 = vpop.xlane.xlu1 %729 }
 0x2c2   : > { %2014 = vrcp.f32 %v730_v4  ;;  %v708_v5 = vpop.xlane.xlu0 %707 }
 0x2c3   : > { %2016 = vrcp.f32 %v708_v5 }
 0x2c5   : > { %v710_v6 = vpop.xlane.xlu1 %709 }
 0x2c6   : > { %v724_v7 = vpop.xlane.xlu0 %723  ;;  %2018 = vrcp.f32 %v710_v6 }
 0x2c7   : > { %v2009_v8 = vpop.eup %2008  ;;  %2020 = vrcp.f32 %v724_v7 }
 0x2c8   : > { %v744_v12 = vmul.f32 %v2009_v8, %v2646_v29 }
 0x2c9   : > { %v726_v9 = vpop.xlane.xlu1 %725 }
 0x2ca   : > { %v720_v10 = vpop.xlane.xlu0 %719  ;;  %2022 = vrcp.f32 %v726_v9 }
 0x2cb   : > { %v2011_v11 = vpop.eup %2010  ;;  %2024 = vrcp.f32 %v720_v10 }
 0x2cc   : > { %v746_v13 = vmul.f32 %v2011_v11, %v2650_v36  ;;  %v2013_v14 = vpop.eup %2012 }
 0x2cd   : > { %v722_v16 = vpop.xlane.xlu1 %721  ;;  %v760_v19 = vmul.f32 %v2013_v14, %v2652_v37 }
 0x2ce   : > { %v1722_v15 = vpack.c.bf16 %v746_v13, %v744_v12  ;;  %v716_v17 = vpop.xlane.xlu0 %715  ;;  %2026 = vrcp.f32 %v722_v16 }
 0x2cf   : > { %v2015_v18 = vpop.eup %2014  ;;  %2028 = vrcp.f32 %v716_v17 }
 0x2d0   : > { %1754 = vst [vmem:[#allocation2 + $0x8] sm:$0xff] %v1722_v15   ;;  %v762_v20 = vmul.f32 %v2015_v18, %v2658_v44  ;;  %v2017_v21 = vpop.eup %2016 }
 0x2d1   : > { %v718_v23 = vpop.xlane.xlu1 %717  ;;  %v740_v26 = vmul.f32 %v2017_v21, %v2660_v45 }
 0x2d2   : > { %v1742_v22 = vpack.c.bf16 %v762_v20, %v760_v19  ;;  %v732_v24 = vpop.xlane.xlu0 %731  ;;  %2030 = vrcp.f32 %v718_v23 }
 0x2d3   : > { %v2019_v25 = vpop.eup %2018  ;;  %2032 = vrcp.f32 %v732_v24 }
 0x2d4   : > { %1758 = vst [vmem:[#allocation2 + $0x28] sm:$0xff] %v1742_v22   ;;  %v742_v27 = vmul.f32 %v2019_v25, %v2668_v53  ;;  %v2021_v28 = vpop.eup %2020 }
 0x2d5   : > { %v734_v29 = vpop.xlane.xlu1 %733  ;;  %v756_v33 = vmul.f32 %v2021_v28, %v2665_v51 }
 0x2d6   : > { %v736_v30 = vpop.xlane.xlu0 %735  ;;  %v1717_v31 = vpack.c.bf16 %v742_v27, %v740_v26  ;;  %2034 = vrcp.f32 %v734_v29 }
 0x2d7   : > { %v2023_v32 = vpop.eup %2022  ;;  %2036 = vrcp.f32 %v736_v30 }
 0x2d8   : > { %1718 = vst [vmem:[#allocation2] sm:$0xff] %v1717_v31   ;;  %v758_v34 = vmul.f32 %v2023_v32, %v2672_v55  ;;  %v2025_v35 = vpop.eup %2024 }
 0x2d9   : > { %v738_v36 = vpop.xlane.xlu1 %737  ;;  %v752_v39 = vmul.f32 %v2025_v35, %v2674_v57 }
 0x2da   : > { %v1737_v37 = vpack.c.bf16 %v758_v34, %v756_v33  ;;  %2038 = vrcp.f32 %v738_v36 }
 0x2db   : > { %v2027_v38 = vpop.eup %2026 }
 0x2dc   : > { %1757 = vst [vmem:[#allocation2 + $0x20] sm:$0xff] %v1737_v37   ;;  %v754_v40 = vmul.f32 %v2027_v38, %v2678_v58  ;;  %v2029_v41 = vpop.eup %2028 }
 0x2dd   : > { %v748_v44 = vmul.f32 %v2029_v41, %v2680_v59 }
 0x2de   : > { %v1732_v42 = vpack.c.bf16 %v754_v40, %v752_v39 }
 0x2df   : > { %v2031_v43 = vpop.eup %2030 }
 0x2e0   : > { %1756 = vst [vmem:[#allocation2 + $0x18] sm:$0xff] %v1732_v42   ;;  %v750_v45 = vmul.f32 %v2031_v43, %v2684_v60  ;;  %v2033_v46 = vpop.eup %2032 }
 0x2e1   : > { %v764_v49 = vmul.f32 %v2033_v46, %v2686_v61 }
 0x2e2   : > { %v1727_v47 = vpack.c.bf16 %v750_v45, %v748_v44 }
 0x2e3   : > { %v2035_v48 = vpop.eup %2034 }
 0x2e4   : > { %1755 = vst [vmem:[#allocation2 + $0x10] sm:$0xff] %v1727_v47   ;;  %v766_v50 = vmul.f32 %v2035_v48, %v2690_v62  ;;  %v2037_v51 = vpop.eup %2036 }
 0x2e5   : > { %v768_v54 = vmul.f32 %v2037_v51, %v2692_v63 }
 0x2e6   : > { %v1747_v52 = vpack.c.bf16 %v766_v50, %v764_v49 }
 0x2e7   : > { %v2039_v53 = vpop.eup %2038 }
 0x2e8   : > { %1759 = vst [vmem:[#allocation2 + $0x30] sm:$0xff] %v1747_v52   ;;  %v770_v55 = vmul.f32 %v2039_v53, %v2696_v0 }
 0x2ea   : > { %v1752_v56 = vpack.c.bf16 %v770_v55, %v768_v54 }
 0x2ec   : > { %1760 = vst [vmem:[#allocation2 + $0x38] sm:$0xff] %v1752_v56  }
 0x2ed PF: > { %v2040_v57 = vld [vmem:[%s2583_s14 + $0x74] ss:$8 sps:$4 sm:$0xff]   ;;  %v2042_v58 = vld [vmem:[%s2583_s14 + $0x70] ss:$8 sps:$4 sm:$0xff]   ;;  %v2285_v59 = vmov 0   ;;  %v2064_v10 = vld [vmem:[#allocation2] sm:$0xff]   ;;  %v885_v18 = vlaneseq }
 0x2ee   : > { %1055 = vmatprep.mubr.bf16.mxu0 %v2285_v59  ;;  %1095 = vmatprep.mubr.bf16.mxu1 %v2285_v59  ;;  %v2043_v60 = vld [vmem:[%s2583_s14 + $0x64] ss:$8 sps:$4 sm:$0xff]   ;;  %v2045_v61 = vld [vmem:[%s2583_s14 + $0x60] ss:$8 sps:$4 sm:$0xff]   ;;  %v2046_v62 = vld [vmem:[%s2583_s14 + $0x54] ss:$8 sps:$4 sm:$0xff]  }
 0x2ef   : > { %1023 = vmatprep.subr.bf16.mxu0 %v2040_v57  ;;  %1825 = vmatprep.subr.bf16.mxu1 %v2040_v57  ;;  %v2048_v63 = vld [vmem:[%s2583_s14 + $0x50] ss:$8 sps:$4 sm:$0xff]   ;;  %v2049_v0 = vld [vmem:[%s2583_s14 + $0x44] ss:$8 sps:$4 sm:$0xff]   ;;  %v2051_v1 = vld [vmem:[%s2583_s14 + $0x40] ss:$8 sps:$4 sm:$0xff]  }
 0x2f0   : > { %1024 = vmatpush1.bf16.msra.mxu0 %v2042_v58  ;;  %1833 = vmatpush1.bf16.msra.mxu1 %v2042_v58  ;;  %v2052_v2 = vld [vmem:[%s2583_s14 + $0x34] ss:$8 sps:$4 sm:$0xff]   ;;  %v2054_v3 = vld [vmem:[%s2583_s14 + $0x30] ss:$8 sps:$4 sm:$0xff]   ;;  %v2055_v4 = vld [vmem:[%s2583_s14 + $0x24] ss:$8 sps:$4 sm:$0xff]  }
 0x2f1   : > { %1025 = vmatprep.subr.bf16.mxu0 %v2043_v60  ;;  %1826 = vmatprep.subr.bf16.mxu1 %v2043_v60  ;;  %v2057_v5 = vld [vmem:[%s2583_s14 + $0x20] ss:$8 sps:$4 sm:$0xff]   ;;  %v2058_v6 = vld [vmem:[%s2583_s14 + $0x14] ss:$8 sps:$4 sm:$0xff]   ;;  %v2060_v7 = vld [vmem:[%s2583_s14 + $0x10] ss:$8 sps:$4 sm:$0xff]  }
 0x2f2   : > { %v2061_v8 = vld [vmem:[%s2583_s14 + $0x4] ss:$8 sps:$4 sm:$0xff]   ;;  %v2063_v9 = vld [vmem:[%s2583_s14] ss:$8 sps:$4 sm:$0xff]   ;;  %v2067_v14 = vld [vmem:[#allocation2 + $0x10] sm:$0xff]   ;;  %v2740_v19 = vshrl.u32 %v885_v18, 7 }
 0x2f3   : > { %v2066_v11 = vld [vmem:[#allocation2 + $0x20] sm:$0xff]   ;;  %v2065_v12 = vld [vmem:[#allocation2 + $0x8] sm:$0xff]   ;;  %v2070_v15 = vld [vmem:[#allocation2 + $0x30] sm:$0xff]   ;;  %vm1390_vm0 = vcmp.lt.s32.totalorder %v885_v18, 256 }
 0x2f4   : > { %1026 = vmatpush1.bf16.msra.mxu0 %v2045_v61  ;;  %1834 = vmatpush1.bf16.msra.mxu1 %v2045_v61  ;;  %v2068_v13 = vld [vmem:[#allocation2 + $0x28] sm:$0xff]   ;;  %v2069_v16 = vld [vmem:[#allocation2 + $0x18] sm:$0xff]   ;;  %v887_v20 = vsub.s32 0, %v2740_v19  ;;  %v891_v21 = vsub.s32 1, %v2740_v19  ;;  %v883_v22 = vld [vmem:[%s2610_s20] sm:$0x3] }
 0x2f5   : > { %1027 = vmatprep.subr.bf16.mxu0 %v2046_v62  ;;  %1827 = vmatprep.subr.bf16.mxu1 %v2046_v62  ;;  %v2071_v17 = vld [vmem:[#allocation2 + $0x38] sm:$0xff]   ;;  %v1249_v52 = vld [vmem:[#allocation6 + $0x8] sm:$0xff]  ;;  %v1248_v56 = vld [vmem:[#allocation6] sm:$0xff] }
 0x2f6   : > { %v2745_v23 = vrot.slane %v883_v22, %v887_v20  ;;  %v2747_v24 = vrot.slane %v883_v22, %v891_v21  ;;  %v1250_v58 = vld [vmem:[#allocation6 + $0x10] sm:$0xff] }
 0x2f8   : > { %1028 = vmatpush1.bf16.msra.mxu0 %v2048_v63  ;;  %1835 = vmatpush1.bf16.msra.mxu1 %v2048_v63 }
 0x2f9   : > { %1029 = vmatprep.subr.bf16.mxu0 %v2049_v0  ;;  %1828 = vmatprep.subr.bf16.mxu1 %v2049_v0 }
 0x2fc   : > { %1030 = vmatpush1.bf16.msra.mxu0 %v2051_v1  ;;  %1836 = vmatpush1.bf16.msra.mxu1 %v2051_v1 }
 0x2fd   : > { %1031 = vmatprep.subr.bf16.mxu0 %v2052_v2  ;;  %1829 = vmatprep.subr.bf16.mxu1 %v2052_v2 }
 0x300   : > { %1032 = vmatpush1.bf16.msra.mxu0 %v2054_v3  ;;  %1837 = vmatpush1.bf16.msra.mxu1 %v2054_v3 }
 0x301   : > { %1033 = vmatprep.subr.bf16.mxu0 %v2055_v4  ;;  %1830 = vmatprep.subr.bf16.mxu1 %v2055_v4 }
 0x304   : > { %1034 = vmatpush1.bf16.msra.mxu0 %v2057_v5  ;;  %1838 = vmatpush1.bf16.msra.mxu1 %v2057_v5 }
 0x305   : > { %1035 = vmatprep.subr.bf16.mxu0 %v2058_v6  ;;  %1831 = vmatprep.subr.bf16.mxu1 %v2058_v6 }
 0x308   : > { %1036 = vmatpush1.bf16.msra.mxu0 %v2060_v7  ;;  %1839 = vmatpush1.bf16.msra.mxu1 %v2060_v7 }
 0x309   : > { %1037 = vmatprep.subr.bf16.mxu0 %v2061_v8  ;;  %1832 = vmatprep.subr.bf16.mxu1 %v2061_v8 }
 0x30c   : > { %1038 = vmatpush1.bf16.msra.mxu0 %v2063_v9  ;;  %1840 = vmatpush1.bf16.msra.mxu1 %v2063_v9  ;;  %v1251_v9 = vld [vmem:[#allocation6 + $0x18] sm:$0xff] }
 0x30f   : > { %1056 = vmatmul.mubr.bf16.vlgmr.msra.gmra.mxu0 %v2064_v10  ;;  %1096 = vmatmul.mubr.bf16.vlgmr.msra.gmra.mxu1 %v2066_v11 }
 0x310   : > { %1065 = vmatprep.mubr.bf16.mxu0 %v2285_v59  ;;  %1105 = vmatprep.mubr.bf16.mxu1 %v2285_v59 }
 0x317   : > { %1066 = vmatmul.mubr.bf16.gmra.mxu0 %v2065_v12  ;;  %1106 = vmatmul.mubr.bf16.gmra.mxu1 %v2068_v13 }
 0x318   : > { %1075 = vmatprep.mubr.bf16.mxu0 %v2285_v59  ;;  %1115 = vmatprep.mubr.bf16.mxu1 %v2285_v59 }
 0x31f   : > { %1076 = vmatmul.mubr.bf16.gmra.mxu0 %v2067_v14  ;;  %1116 = vmatmul.mubr.bf16.gmra.mxu1 %v2070_v15 }
 0x320   : > { %1085 = vmatprep.mubr.bf16.mxu0 %v2285_v59  ;;  %1125 = vmatprep.mubr.bf16.mxu1 %v2285_v59 }
 0x327   : > { %1086 = vmatmul.mubr.bf16.gmra.mxu0 %v2069_v16  ;;  %1126 = vmatmul.mubr.bf16.gmra.mxu1 %v2071_v17  ;;  %v1252_v17 = vld [vmem:[#allocation6 + $0x20] sm:$0xff] }
 0x3cf   : > { %v1057_v25 = vpop.f32.mrf.mxu0  ;;  %v1097_v26 = vpop.f32.mrf.mxu1 }
 0x3d0   : > { %v2750_v28 = vadd.f32 %v1097_v26, %v2745_v23  ;;  %v1058_v30 = vadd.f32 %v1057_v25, %v2745_v23 }
 0x3d1   : > { %v1059_v27 = vpop.f32.mrf.mxu0  ;;  %v1099_v29 = vpop.f32.mrf.mxu1 }
 0x3d2   : > { %v1060_v31 = vadd.f32 %v1059_v27, %v2747_v24  ;;  %v2755_v32 = vadd.f32 %v1099_v29, %v2747_v24  ;;  %v1264_v2 = vsub.f32 %v1058_v30, %v1248_v56 }
 0x3d3   : > { %v1061_v33 = vpop.f32.mrf.mxu0  ;;  %v1101_v34 = vpop.f32.mrf.mxu1 }
 0x3d4   : > { %v1698_v35 = vpack.c.bf16 %v1060_v31, %v1058_v30  ;;  %v1706_v37 = vpack.c.bf16 %v2755_v32, %v2750_v28  ;;  %v2760_v38 = vadd.f32 %v1101_v34, %v2745_v23  ;;  %v1062_v40 = vadd.f32 %v1061_v33, %v2745_v23 }
 0x3d5   : > { %v1063_v36 = vpop.f32.mrf.mxu0  ;;  %v1103_v39 = vpop.f32.mrf.mxu1  ;;  %v1265_v7 = vsub.f32 %v1060_v31, %v1248_v56  ;;  %v1296_v22 = vmul.f32 %v1264_v2, %v1264_v2 }
 0x3d6   : > { %1232 = vst [vmem:[%s2615_s12] sm:$0xff] %v1698_v35  ;;  %v1064_v41 = vadd.f32 %v1063_v36, %v2747_v24  ;;  %v2766_v42 = vadd.f32 %v1103_v39, %v2747_v24  ;;  %1240 = vst [vmem:[%s2615_s12 + $0x40] sm:$0xff] %v1706_v37  ;;  %v1266_v62 = vsub.f32 %v1062_v40, %v1249_v52  ;;  %v1253_v36 = vld [vmem:[#allocation6 + $0x28] sm:$0xff] }
 0x3d7   : > { %v1067_v43 = vpop.f32.mrf.mxu0  ;;  %v1107_v44 = vpop.f32.mrf.mxu1  ;;  %v1297_v31 = vmul.f32 %v1265_v7, %v1265_v7 }
 0x3d8   : > { %v1699_v45 = vpack.c.bf16 %v1064_v41, %v1062_v40  ;;  %v1707_v47 = vpack.c.bf16 %v2766_v42, %v2760_v38  ;;  %v2772_v48 = vadd.f32 %v1107_v44, %v2745_v23  ;;  %v1068_v50 = vadd.f32 %v1067_v43, %v2745_v23 }
 0x3d9   : > { %v1069_v46 = vpop.f32.mrf.mxu0  ;;  %v1109_v49 = vpop.f32.mrf.mxu1  ;;  %v1267_v3 = vsub.f32 %v1064_v41, %v1249_v52  ;;  %v1298_v16 = vmul.f32 %v1266_v62, %v1266_v62 }
 0x3da   : > { %1233 = vst [vmem:[%s2615_s12 + $0x8] sm:$0xff] %v1699_v45  ;;  %v1070_v51 = vadd.f32 %v1069_v46, %v2747_v24  ;;  %1241 = vst [vmem:[%s2615_s12 + $0x48] sm:$0xff] %v1707_v47  ;;  %v2779_v54 = vadd.f32 %v1109_v49, %v2747_v24  ;;  %v1268_v8 = vsub.f32 %v1068_v50, %v1250_v58 }
 0x3db   : > { %v1071_v53 = vpop.f32.mrf.mxu0  ;;  %v1111_v55 = vpop.f32.mrf.mxu1  ;;  %v1299_v25 = vmul.f32 %v1267_v3, %v1267_v3  ;;  %v1328_v45 = vadd.f32 %v1298_v16, %v1296_v22 }
 0x3dc   : > { %v1700_v57 = vpack.c.bf16 %v1070_v51, %v1068_v50  ;;  %v1708_v60 = vpack.c.bf16 %v2779_v54, %v2772_v48  ;;  %v1072_v63 = vadd.f32 %v1071_v53, %v2745_v23  ;;  %v2787_v1 = vadd.f32 %v1111_v55, %v2745_v23  ;;  %v1254_v55 = vld [vmem:[#allocation6 + $0x30] sm:$0xff] }
 0x3dd   : > { %v1073_v59 = vpop.f32.mrf.mxu0  ;;  %v1113_v61 = vpop.f32.mrf.mxu1  ;;  %v1269_v11 = vsub.f32 %v1070_v51, %v1250_v58  ;;  %v1300_v33 = vmul.f32 %v1268_v8, %v1268_v8  ;;  %v1349_v50 = vadd.f32 %v1299_v25, %v1297_v31  ;;  %v1255_v25 = vld [vmem:[#allocation6 + $0x38] sm:$0xff] }
 0x3de   : > { %1234 = vst [vmem:[%s2615_s12 + $0x10] sm:$0xff] %v1700_v57  ;;  %v1074_v0 = vadd.f32 %v1073_v59, %v2747_v24  ;;  %1242 = vst [vmem:[%s2615_s12 + $0x50] sm:$0xff] %v1708_v60  ;;  %v2791_v5 = vadd.f32 %v1113_v61, %v2747_v24  ;;  %v1270_v26 = vsub.f32 %v1072_v63, %v1251_v9 }
 0x3df   : > { %v1077_v4 = vpop.f32.mrf.mxu0  ;;  %v1117_v6 = vpop.f32.mrf.mxu1  ;;  %v1301_v37 = vmul.f32 %v1269_v11, %v1269_v11  ;;  %v1329_v62 = vadd.f32 %v1328_v45, %v1300_v33 }
 0x3e0   : > { %v1701_v10 = vpack.c.bf16 %v1074_v0, %v1072_v63  ;;  %v1078_v12 = vadd.f32 %v1077_v4, %v2745_v23  ;;  %v1709_v14 = vpack.c.bf16 %v2791_v5, %v2787_v1  ;;  %v2799_v21 = vadd.f32 %v1117_v6, %v2745_v23 }
 0x3e1   : > { %v1079_v13 = vpop.f32.mrf.mxu0  ;;  %v1119_v15 = vpop.f32.mrf.mxu1  ;;  %v1271_v34 = vsub.f32 %v1074_v0, %v1251_v9  ;;  %v1302_v51 = vmul.f32 %v1270_v26, %v1270_v26  ;;  %v1350_v63 = vadd.f32 %v1349_v50, %v1301_v37 }
 0x3e2   : > { %1235 = vst [vmem:[%s2615_s12 + $0x18] sm:$0xff] %v1701_v10  ;;  %v1080_v20 = vadd.f32 %v1079_v13, %v2747_v24  ;;  %1243 = vst [vmem:[%s2615_s12 + $0x58] sm:$0xff] %v1709_v14  ;;  %v2803_v29 = vadd.f32 %v1119_v15, %v2747_v24  ;;  %v1272_v39 = vsub.f32 %v1078_v12, %v1252_v17  ;;  %v1256_v15 = vld [vmem:[#allocation6 + $0x40] sm:$0xff] }
 0x3e3   : > { %v1081_v27 = vpop.f32.mrf.mxu0  ;;  %v1121_v30 = vpop.f32.mrf.mxu1  ;;  %v1303_v58 = vmul.f32 %v1271_v34, %v1271_v34  ;;  %v1330_v10 = vadd.f32 %v1329_v62, %v1302_v51 }
 0x3e4   : > { %v1702_v35 = vpack.c.bf16 %v1080_v20, %v1078_v12  ;;  %v1082_v40 = vadd.f32 %v1081_v27, %v2745_v23  ;;  %v1710_v43 = vpack.c.bf16 %v2803_v29, %v2799_v21  ;;  %v1273_v46 = vsub.f32 %v1080_v20, %v1252_v17 }
 0x3e5   : > { %v1083_v41 = vpop.f32.mrf.mxu0  ;;  %v1123_v44 = vpop.f32.mrf.mxu1  ;;  %v2811_v49 = vadd.f32 %v1121_v30, %v2745_v23  ;;  %v1304_v0 = vmul.f32 %v1272_v39, %v1272_v39  ;;  %v1351_v16 = vadd.f32 %v1350_v63, %v1303_v58  ;;  %v1259_v58 = vld [vmem:[#allocation6 + $0x58] sm:$0xff] }
 0x3e6   : > { %1236 = vst [vmem:[%s2615_s12 + $0x20] sm:$0xff] %v1702_v35  ;;  %v1084_v47 = vadd.f32 %v1083_v41, %v2747_v24  ;;  %v1274_v52 = vsub.f32 %v1082_v40, %v1253_v36  ;;  %1244 = vst [vmem:[%s2615_s12 + $0x60] sm:$0xff] %v1710_v43  ;;  %v2815_v56 = vadd.f32 %v1123_v44, %v2747_v24  ;;  %v1257_v35 = vld [vmem:[#allocation6 + $0x48] sm:$0xff] }
 0x3e7   : > { %v1087_v53 = vpop.f32.mrf.mxu0  ;;  %v1127_v57 = vpop.f32.mrf.mxu1  ;;  %v1305_v6 = vmul.f32 %v1273_v46, %v1273_v46  ;;  %v1331_v26 = vadd.f32 %v1330_v10, %v1304_v0  ;;  %v1280_v41 = vsub.f32 %v2750_v28, %v1256_v15  ;;  %v1281_v46 = vsub.f32 %v2755_v32, %v1256_v15  ;;  %v1260_v0 = vld [vmem:[#allocation6 + $0x60] sm:$0xff] }
 0x3e8   : > { %v1703_v59 = vpack.c.bf16 %v1084_v47, %v1082_v40  ;;  %v1275_v60 = vsub.f32 %v1084_v47, %v1253_v36  ;;  %v1088_v61 = vadd.f32 %v1087_v53, %v2745_v23  ;;  %v1711_v3 = vpack.c.bf16 %v2815_v56, %v2811_v49  ;;  %v1258_v47 = vld [vmem:[#allocation6 + $0x50] sm:$0xff] }
 0x3e9   : > { %v1089_v2 = vpop.f32.mrf.mxu0  ;;  %v1129_v4 = vpop.f32.mrf.mxu1  ;;  %v2823_v9 = vadd.f32 %v1127_v57, %v2745_v23  ;;  %v1306_v11 = vmul.f32 %v1274_v52, %v1274_v52  ;;  %v1352_v36 = vadd.f32 %v1351_v16, %v1305_v6  ;;  %v1282_v53 = vsub.f32 %v2760_v38, %v1257_v35 }
 0x3ea   : > { %1237 = vst [vmem:[%s2615_s12 + $0x28] sm:$0xff] %v1703_v59  ;;  %v1276_v7 = vsub.f32 %v1088_v61, %v1254_v55  ;;  %v1090_v8 = vadd.f32 %v1089_v2, %v2747_v24  ;;  %1245 = vst [vmem:[%s2615_s12 + $0x68] sm:$0xff] %v1711_v3  ;;  %v2827_v13 = vadd.f32 %v1129_v4, %v2747_v24 }
 0x3eb   : > { %v1091_v12 = vpop.f32.mrf.mxu0  ;;  %v1131_v14 = vpop.f32.mrf.mxu1  ;;  %v1307_v17 = vmul.f32 %v1275_v60, %v1275_v60  ;;  %v1332_v43 = vadd.f32 %v1331_v26, %v1306_v11  ;;  %v1283_v28 = vsub.f32 %v2766_v42, %v1257_v35  ;;  %v1313_v62 = vmul.f32 %v1281_v46, %v1281_v46 }
 0x3ec   : > { %v1704_v20 = vpack.c.bf16 %v1090_v8, %v1088_v61  ;;  %v1277_v22 = vsub.f32 %v1090_v8, %v1254_v55  ;;  %v1308_v27 = vmul.f32 %v1276_v7, %v1276_v7  ;;  %v1092_v30 = vadd.f32 %v1091_v12, %v2745_v23  ;;  %v1261_v8 = vld [vmem:[#allocation6 + $0x68] sm:$0xff] }
 0x3ed   : > { %v1093_v31 = vpop.f32.mrf.mxu0  ;;  %v1712_v33 = vpack.c.bf16 %v2827_v13, %v2823_v9  ;;  %v1133_v34 = vpop.f32.mrf.mxu1  ;;  %v1132_v40 = vadd.f32 %v1131_v14, %v2745_v23  ;;  %v1353_v50 = vadd.f32 %v1352_v36, %v1307_v17  ;;  %v1312_v61 = vmul.f32 %v1280_v41, %v1280_v41 }
 0x3ee   : > { %1238 = vst [vmem:[%s2615_s12 + $0x30] sm:$0xff] %v1704_v20  ;;  %v1309_v37 = vmul.f32 %v1277_v22, %v1277_v22  ;;  %v1094_v39 = vadd.f32 %v1093_v31, %v2747_v24  ;;  %v1278_v44 = vsub.f32 %v1092_v30, %v1255_v25  ;;  %v1134_v45 = vadd.f32 %v1133_v34, %v2747_v24 }
 0x3ef   : > { %1246 = vst [vmem:[%s2615_s12 + $0x70] sm:$0xff] %v1712_v33  ;;  %v1333_v55 = vadd.f32 %v1332_v43, %v1308_v27  ;;  %v1284_v24 = vsub.f32 %v2772_v48, %v1258_v47  ;;  %v1285_v63 = vsub.f32 %v2779_v54, %v1258_v47  ;;  %v1314_v38 = vmul.f32 %v1282_v53, %v1282_v53  ;;  %v1262_v54 = vld [vmem:[#allocation6 + $0x70] sm:$0xff] }
 0x3f0   : > { %v1705_v51 = vpack.c.bf16 %v1094_v39, %v1092_v30  ;;  %v1279_v52 = vsub.f32 %v1094_v39, %v1255_v25  ;;  %v1310_v57 = vmul.f32 %v1278_v44, %v1278_v44  ;;  %v1713_v23 = vpack.c.bf16 %v1134_v45, %v1132_v40 }
 0x3f1   : > { %v1354_v59 = vadd.f32 %v1353_v50, %v1309_v37  ;;  %v1286_v3 = vsub.f32 %v2787_v1, %v1259_v58  ;;  %v1315_v6 = vmul.f32 %v1283_v28, %v1283_v28  ;;  %v1287_v42 = vsub.f32 %v2791_v5, %v1259_v58  ;;  %v1263_v5 = vld [vmem:[#allocation6 + $0x78] sm:$0xff] }
 0x3f2   : > { %1239 = vst [vmem:[%s2615_s12 + $0x38] sm:$0xff] %v1705_v51  ;;  %v1311_v60 = vmul.f32 %v1279_v52, %v1279_v52  ;;  %v1334_v32 = vadd.f32 %v1333_v55, %v1310_v57  ;;  %1247 = vst [vmem:[%s2615_s12 + $0x78] sm:$0xff] %v1713_v23  ;;  %v1316_v10 = vmul.f32 %v1284_v24, %v1284_v24  ;;  %v2286_v57 = vmov 1966171168  }
 0x3f3   : > { %v1288_v11 = vsub.f32 %v2799_v21, %v1260_v0  ;;  %v1317_v12 = vmul.f32 %v1285_v63, %v1285_v63  ;;  %v1289_v14 = vsub.f32 %v2803_v29, %v1260_v0  ;;  %v1318_v16 = vmul.f32 %v1286_v3, %v1286_v3 }
 0x3f4   : > { %v1355_v2 = vadd.f32 %v1354_v59, %v1311_v60  ;;  %v1335_v4 = vadd.f32 %v1334_v32, %v1312_v61  ;;  %v1290_v17 = vsub.f32 %v2811_v49, %v1261_v8  ;;  %v1319_v1 = vmul.f32 %v1287_v42, %v1287_v42 }
 0x3f5   : > { %v1291_v22 = vsub.f32 %v2815_v56, %v1261_v8  ;;  %v1320_v26 = vmul.f32 %v1288_v11, %v1288_v11  ;;  %v1292_v30 = vsub.f32 %v2823_v9, %v1262_v54  ;;  %v1321_v21 = vmul.f32 %v1289_v14, %v1289_v14 }
 0x3f6   : > { %v1356_v7 = vadd.f32 %v1355_v2, %v1313_v62  ;;  %v1336_v48 = vadd.f32 %v1335_v4, %v1314_v38  ;;  %v1293_v33 = vsub.f32 %v2827_v13, %v1262_v54  ;;  %v1322_v29 = vmul.f32 %v1290_v17, %v1290_v17 }
 0x3f7   : > { %v1294_v35 = vsub.f32 %v1132_v40, %v1263_v5  ;;  %v1323_v36 = vmul.f32 %v1291_v22, %v1291_v22  ;;  %v1295_v49 = vsub.f32 %v1134_v45, %v1263_v5  ;;  %v1324_v41 = vmul.f32 %v1292_v30, %v1292_v30 }
 0x3f8   : > { %v1357_v15 = vadd.f32 %v1356_v7, %v1315_v6  ;;  %v1337_v20 = vadd.f32 %v1336_v48, %v1316_v10  ;;  %v1325_v56 = vmul.f32 %v1293_v33, %v1293_v33  ;;  %v1374_v40 = vunpack.c.l.s4 %v2286_v57 }
 0x3f9   : > { %v1326_v46 = vmul.f32 %v1294_v35, %v1294_v35  ;;  %v1327_v50 = vmul.f32 %v1295_v49, %v1295_v49 }
 0x3fa   : > { %v1358_v25 = vadd.f32 %v1357_v15, %v1317_v12  ;;  %v1338_v27 = vadd.f32 %v1337_v20, %v1318_v16  ;;  %v1375_v59 = vunpack.c.0.s8 %v1374_v40 }
 0x3fc   : > { %v1359_v31 = vadd.f32 %v1358_v25, %v1319_v1  ;;  %v1339_v34 = vadd.f32 %v1338_v27, %v1320_v26  ;;  %v1378_v62 = vsub.s32 %v1375_v59, %v2740_v19 }
 0x3fe   : > { %v1360_v37 = vadd.f32 %v1359_v31, %v1321_v21  ;;  %v1340_v39 = vadd.f32 %v1339_v34, %v1322_v29 }
 0x400   : > { %v1361_v43 = vadd.f32 %v1360_v37, %v1323_v36  ;;  %v1341_v44 = vadd.f32 %v1340_v39, %v1324_v41 }
 0x402   : > { %v1362_v47 = vadd.f32 %v1361_v43, %v1325_v56  ;;  %v1342_v51 = vadd.f32 %v1341_v44, %v1326_v46 }
 0x404   : > { %v1363_v9 = vadd.f32 %v1362_v47, %v1327_v50  ;;  %v1343_v52 = vrot.slane %v1342_v51, 4 }
 0x406   : > { %v1364_v53 = vrot.slane %v1363_v9, 4  ;;  %v1344_v55 = vadd.f32 %v1343_v52, %v1342_v51 }
 0x408   : > { %v1365_v13 = vadd.f32 %v1364_v53, %v1363_v9  ;;  %v1345_v23 = vrot.slane %v1344_v55, 2 }
 0x40a   : > { %v1366_v28 = vrot.slane %v1365_v13, 2  ;;  %v1346_v45 = vadd.f32 %v1345_v23, %v1344_v55 }
 0x40c   : > { %v1367_v58 = vadd.f32 %v1366_v28, %v1365_v13  ;;  %v1347_v60 = vrot.slane %v1346_v45, 1 }
 0x40e   : > { %v1368_v61 = vrot.slane %v1367_v58, 1  ;;  %v1348_v24 = vadd.f32 %v1347_v60, %v1346_v45 }
 0x410   : > { %v1369_v32 = vadd.f32 %v1368_v61, %v1367_v58 }
 0x412   : > { %v1372_v63 = vcombine.low %v1348_v24, %v1369_v32 }
 0x414   : > { %v1379_v0 = vrot.slane %v1372_v63, %v1378_v62 }
 0x416   : > { %v1386_v2 = vrot.slane %v1379_v0, %v1378_v62 }
 0x418   : > { %1392 = vst.msk [vmem:[%s420_s10] sm:$0x3] %vm1390_vm0, %v1386_v2 }
 0x419 PF: > { %s31_s21 = sadd.s32 1, %s2274_s21   ;;  %s2955_s7 = sld [smem:[#allocation24_spill]] }
 0x41a   : > { %p28_p13 = scmp.ge.s32.totalorder %s31_s21, 6   ;;  %s2956_s17 = sld [smem:[#allocation20_spill]] }
 0x41b   : > { %s2957_s18 = sld [smem:[#allocation21_spill]]  ;;  %s2960_s0 = smov %s2238_s13 }
 0x41c   : > { %s2958_s19 = sld [smem:[#allocation22_spill]]  ;;  %s2961_s13 = smov %s2242_s1 }
 0x41d   : > { %s2959_s20 = sld [smem:[#allocation23_spill]]  ;;  %s2962_s1 = smov %s2531_s24 }
 0x41e   : > { %s2963_s14 = smov %s2250_s15  ;;  %s2964_s15 = smov %s2254_s16 }
 0x41f   : > { %s2965_s16 = smov %s2955_s7  ;;  %30 = sbr.rel (!%p28_p13) target bundleno = 25 (0x19), region = 118 }
 0x424   :  { %1444 = vsyncpa [#allocation7], 1 }
 0x425   :  { %1446 = vsyncpa [#allocation7 + $0x1], 1 }
 0x426   :  { %1447 = vsyncpa [#allocation9], 1 }
 0x427   :  { %1449 = vsyncpa [#allocation9 + $0x1], 1 }

</bundles_post_ra>
